<compile_context>
chip_gen: v7x
topology: tpu7x:2x2x1
jax: 0.10.0
libtpu: 0.0.40
codegen_flags: <defaults>
</compile_context>

<pallas_src>
import functools
import math

import jax
import jax.numpy as jnp
from jax import lax
from jax.experimental import pallas as pl
from jax.experimental.pallas import tpu as pltpu


class Config:
    emb_dim = 128
    hidden_dim = 256
    num_heads = 4
    eps = 1e-12
    attn_drop_rate = 0.1   # eval mode -> identity
    fc_drop_rate = 0.1     # eval mode -> identity


_GELU_C = math.sqrt(2.0 / math.pi)


def _encoder_layer_kernel(x_ref, wqkv_ref, bqkv_ref, woh_ref,
                          w1_ref, b1_ref, w2_ref, vec_ref,
                          out_ref, *, num_heads, eps):
    x = x_ref[...]                                   # (S, D) f32 slab of this batch
    D = x.shape[-1]
    hd = D // num_heads
    scale = 1.0 / math.sqrt(hd)

    def layer_norm(t, g, b):
        m = jnp.mean(t, axis=-1, keepdims=True)
        v = jnp.mean(jnp.square(t - m), axis=-1, keepdims=True)
        return (t - m) * lax.rsqrt(v + eps) * g + b

    # packed (1, D) vectors: [bo, ln1_gamma, ln1_beta, b2, ln2_gamma, ln2_beta]
    bo  = vec_ref[0:1, :]
    g1  = vec_ref[1:2, :]
    be1 = vec_ref[2:3, :]
    b2  = vec_ref[3:4, :]
    g2  = vec_ref[4:5, :]
    be2 = vec_ref[5:6, :]

    # ---- fused QKV projection: single MXU pass over the (D, 3D) weight slab ----
    qkv = jnp.dot(x, wqkv_ref[...], preferred_element_type=jnp.float32) + bqkv_ref[...]

    # ---- multi-head self-attention (attn_dropout: eval identity) ----
    # TODO(synk): optional attention mask (scores -= 10000*(1-mask)) not wired;
    #             this kernel implements the mask=None path only.
    attn = jnp.broadcast_to(bo, x.shape)             # start from output-proj bias
    for h in range(num_heads):                       # static unroll, num_heads small
        qh = qkv[:, h * hd:(h + 1) * hd]
        kh = qkv[:, D + h * hd:D + (h + 1) * hd]
        vh = qkv[:, 2 * D + h * hd:2 * D + (h + 1) * hd]
        s = lax.dot_general(qh, kh, (((1,), (1,)), ((), ())),
                            preferred_element_type=jnp.float32) * scale   # (S, S)
        s = s - jnp.max(s, axis=-1, keepdims=True)
        p = jnp.exp(s)
        p = p / jnp.sum(p, axis=-1, keepdims=True)
        zh = jnp.dot(p, vh, preferred_element_type=jnp.float32)           # (S, hd)
        # per-head output projection slab -> no lane concat of heads
        attn = attn + jnp.dot(zh, woh_ref[h], preferred_element_type=jnp.float32)

    # ---- residual + LayerNorm (enc_drop: eval identity) ----
    y = layer_norm(x + attn, g1, be1)

    # ---- feed-forward (fc_dropout: eval identity) ----
    hid = jnp.dot(y, w1_ref[...], preferred_element_type=jnp.float32) + b1_ref[...]
    hid = 0.5 * hid * (1.0 + jnp.tanh(_GELU_C * (hid + 0.044715 * hid * hid * hid)))
    f = jnp.dot(hid, w2_ref[...], preferred_element_type=jnp.float32) + b2
    out_ref[...] = layer_norm(f + y, g2, be2).astype(out_ref.dtype)


def encoder_layer_forward(embeddings, params, *, num_heads, eps=1e-12, mask=None):
    if mask is not None:
        raise NotImplementedError("TODO(synk): attention-mask path not implemented")
    (wq, bq, wk, bk, wv, bv, wo, bo,
     g1, be1, w1, b1, w2, b2, g2, be2) = params

    B, S, D = embeddings.shape
    hd = D // num_heads
    f32 = jnp.float32
    x = embeddings.astype(f32)

    # Host-side repacking (free, one-time): fused QKV, per-head Wo slabs, and a
    # single slab holding all (1, D) bias / LayerNorm vectors.
    wqkv = jnp.concatenate([wq, wk, wv], axis=1).astype(f32)                  # (D, 3D)
    bqkv = jnp.concatenate([bq, bk, bv], axis=1).astype(f32)                  # (1, 3D)
    wo_h = wo.astype(f32).reshape(num_heads, hd, D)                           # (H, hd, D)
    vecs = jnp.concatenate([bo, g1, be1, b2, g2, be2], axis=0).astype(f32)    # (6, D)

    # Whole-array VMEM residency for every parameter: loaded once, reused by all
    # grid steps (no per-step parameter DMAs, no double buffering of weights).
    def param_spec():
        return pl.BlockSpec(memory_space=pltpu.MemorySpace.VMEM)

    grid_spec = pltpu.PrefetchScalarGridSpec(
        num_scalar_prefetch=0,
        grid=(B,),
        in_specs=[pl.BlockSpec((None, S, D), lambda b: (b, 0, 0))]   # x slab, squeezed
                 + [param_spec() for _ in range(7)],
        out_specs=pl.BlockSpec((None, S, D), lambda b: (b, 0, 0)),
    )

    return pl.pallas_call(
        functools.partial(_encoder_layer_kernel, num_heads=num_heads, eps=eps),
        out_shape=jax.ShapeDtypeStruct((B, S, D), f32),
        grid_spec=grid_spec,
        compiler_params=pltpu.CompilerParams(
            dimension_semantics=("parallel",)),      # batch slabs are independent
    )(x, wqkv, bqkv, wo_h,
      w1.astype(f32), b1.astype(f32), w2.astype(f32), vecs)


def _reference(x, params, *, num_heads, eps):
    (wq, bq, wk, bk, wv, bv, wo, bo,
     g1, be1, w1, b1, w2, b2, g2, be2) = params
    B, S, D = x.shape
    hd = D // num_heads
    dot = functools.partial(jnp.matmul, precision=lax.Precision.HIGHEST)

    def layer_norm(t, g, b):
        m = jnp.mean(t, axis=-1, keepdims=True)
        v = jnp.mean(jnp.square(t - m), axis=-1, keepdims=True)
        return (t - m) / jnp.sqrt(v + eps) * g + b

    def split_heads(t):
        return t.reshape(B, S, num_heads, hd).transpose(0, 2, 1, 3)

    q = split_heads(dot(x, wq) + bq)
    k = split_heads(dot(x, wk) + bk)
    v = split_heads(dot(x, wv) + bv)
    scores = dot(q, jnp.swapaxes(k, -1, -2)) / math.sqrt(hd)
    p = jax.nn.softmax(scores, axis=-1)
    z = dot(p, v).transpose(0, 2, 1, 3).reshape(B, S, D)
    attn = dot(z, wo) + bo
    y = layer_norm(x + attn, g1, be1)
    h = dot(y, w1) + b1
    h = 0.5 * h * (1.0 + jnp.tanh(_GELU_C * (h + 0.044715 * h ** 3)))
    f = dot(h, w2) + b2 + y
    return layer_norm(f, g2, be2)


if __name__ == "__main__":
    cfg = Config()
    B, S, D, Hid = 2, 8, cfg.emb_dim, cfg.hidden_dim

    ks = jax.random.split(jax.random.PRNGKey(0), 17)

    def init(k, shape, scale=0.02):
        return scale * jax.random.normal(k, shape, jnp.float32)

    params = (
        init(ks[0], (D, D)),  init(ks[1], (1, D)),                    # Wq, bq
        init(ks[2], (D, D)),  init(ks[3], (1, D)),                    # Wk, bk
        init(ks[4], (D, D)),  init(ks[5], (1, D)),                    # Wv, bv
        init(ks[6], (D, D)),  init(ks[7], (1, D)),                    # Wo, bo
        1.0 + init(ks[8], (1, D), 0.1), init(ks[9], (1, D), 0.1),     # LN1 gamma/beta
        init(ks[10], (D, Hid)), init(ks[11], (1, Hid)),               # W1, b1
        init(ks[12], (Hid, D)), init(ks[13], (1, D)),                 # W2, b2
        1.0 + init(ks[14], (1, D), 0.1), init(ks[15], (1, D), 0.1),   # LN2 gamma/beta
    )

    embeddings = jax.random.normal(ks[16], (B, S, D), jnp.float32)

    out = encoder_layer_forward(embeddings, params,
                                num_heads=cfg.num_heads, eps=cfg.eps)
    out = jax.block_until_ready(out)

    ref = _reference(embeddings, params, num_heads=cfg.num_heads, eps=cfg.eps)
    assert out.shape == (B, S, D)
    max_err = float(jnp.max(jnp.abs(out - ref)))
    assert jnp.allclose(out, ref, atol=1e-3, rtol=1e-3), f"max abs err {max_err}"

    print("KERNEL_OK")
</pallas_src>

<mosaic_0001>
module attributes {stable_mosaic.version = 11 : i64} {
  func.func @_encoder_layer_kernel(%arg0: i32, %arg1: memref<1x8x128xf32, #tpu.memory_space<vmem>>, %arg2: memref<128x384xf32, #tpu.memory_space<vmem>>, %arg3: memref<1x384xf32, #tpu.memory_space<vmem>>, %arg4: memref<4x32x128xf32, #tpu.memory_space<vmem>>, %arg5: memref<128x256xf32, #tpu.memory_space<vmem>>, %arg6: memref<1x256xf32, #tpu.memory_space<vmem>>, %arg7: memref<256x128xf32, #tpu.memory_space<vmem>>, %arg8: memref<6x128xf32, #tpu.memory_space<vmem>>, %arg9: memref<1x8x128xf32, #tpu.memory_space<vmem>>) attributes {dimension_semantics = [#tpu.dimension_semantics<parallel>], iteration_bounds = array<i64: 2>, scalar_prefetch = 0 : i64, scratch_operands = 0 : i64, tpu.core_type = #tpu.core_type<tc>, window_params = [{transform_indices = @transform_0, window_bounds = array<i64: 1, 8, 128>}, {pipeline_mode = #tpu.pipeline_mode<synchronous>, transform_indices = @transform_1, window_bounds = array<i64: 128, 384>}, {pipeline_mode = #tpu.pipeline_mode<synchronous>, transform_indices = @transform_2, window_bounds = array<i64: 1, 384>}, {pipeline_mode = #tpu.pipeline_mode<synchronous>, transform_indices = @transform_3, window_bounds = array<i64: 4, 32, 128>}, {pipeline_mode = #tpu.pipeline_mode<synchronous>, transform_indices = @transform_4, window_bounds = array<i64: 128, 256>}, {pipeline_mode = #tpu.pipeline_mode<synchronous>, transform_indices = @transform_5, window_bounds = array<i64: 1, 256>}, {pipeline_mode = #tpu.pipeline_mode<synchronous>, transform_indices = @transform_6, window_bounds = array<i64: 256, 128>}, {pipeline_mode = #tpu.pipeline_mode<synchronous>, transform_indices = @transform_7, window_bounds = array<i64: 6, 128>}, {transform_indices = @transform_8, window_bounds = array<i64: 1, 8, 128>}]} {
    %c0 = arith.constant 0 : index
    %c0_0 = arith.constant 0 : index
    %c0_1 = arith.constant 0 : index
    %0 = vector.load %arg1[%c0, %c0_0, %c0_1] : memref<1x8x128xf32, #tpu.memory_space<vmem>>, vector<1x8x128xf32>
    %1 = vector.shape_cast %0 : vector<1x8x128xf32> to vector<8x128xf32>
    %c0_2 = arith.constant 0 : index
    %c0_3 = arith.constant 0 : index
    %2 = vector.load %arg8[%c0_2, %c0_3] : memref<6x128xf32, #tpu.memory_space<vmem>>, vector<1x128xf32>
    %c1 = arith.constant 1 : index
    %c0_4 = arith.constant 0 : index
    %3 = vector.load %arg8[%c1, %c0_4] : memref<6x128xf32, #tpu.memory_space<vmem>>, vector<1x128xf32>
    %c2 = arith.constant 2 : index
    %c0_5 = arith.constant 0 : index
    %4 = vector.load %arg8[%c2, %c0_5] : memref<6x128xf32, #tpu.memory_space<vmem>>, vector<1x128xf32>
    %c3 = arith.constant 3 : index
    %c0_6 = arith.constant 0 : index
    %5 = vector.load %arg8[%c3, %c0_6] : memref<6x128xf32, #tpu.memory_space<vmem>>, vector<1x128xf32>
    %c4 = arith.constant 4 : index
    %c0_7 = arith.constant 0 : index
    %6 = vector.load %arg8[%c4, %c0_7] : memref<6x128xf32, #tpu.memory_space<vmem>>, vector<1x128xf32>
    %c5 = arith.constant 5 : index
    %c0_8 = arith.constant 0 : index
    %7 = vector.load %arg8[%c5, %c0_8] : memref<6x128xf32, #tpu.memory_space<vmem>>, vector<1x128xf32>
    %c0_9 = arith.constant 0 : index
    %c0_10 = arith.constant 0 : index
    %8 = vector.load %arg2[%c0_9, %c0_10] : memref<128x384xf32, #tpu.memory_space<vmem>>, vector<128x384xf32>
    %cst = arith.constant dense<0.000000e+00> : vector<8x384xf32>
    %9 = tpu.matmul %1, %8, %cst {dimension_numbers = #tpu.dot_dimension_numbers<[1], [0], [0], [1], [0, 0, 1, 1], [], []>} : vector<8x128xf32>, vector<128x384xf32>, vector<8x384xf32> -> vector<8x384xf32>
    %c0_11 = arith.constant 0 : index
    %c0_12 = arith.constant 0 : index
    %10 = vector.load %arg3[%c0_11, %c0_12] : memref<1x384xf32, #tpu.memory_space<vmem>>, vector<1x384xf32>
    %11 = vector.broadcast %10 : vector<1x384xf32> to vector<8x384xf32>
    %12 = arith.addf %9, %11 : vector<8x384xf32>
    %13 = vector.shape_cast %2 : vector<1x128xf32> to vector<1x128xf32>
    %14 = vector.broadcast %13 : vector<1x128xf32> to vector<8x128xf32>
    %15 = vector.extract_strided_slice %12 {offsets = [0, 0], sizes = [8, 32], strides = [1, 1]} : vector<8x384xf32> to vector<8x32xf32>
    %16 = vector.extract_strided_slice %12 {offsets = [0, 128], sizes = [8, 32], strides = [1, 1]} : vector<8x384xf32> to vector<8x32xf32>
    %17 = vector.extract_strided_slice %12 {offsets = [0, 256], sizes = [8, 32], strides = [1, 1]} : vector<8x384xf32> to vector<8x32xf32>
    %cst_13 = arith.constant dense<0.000000e+00> : vector<8x8xf32>
    %18 = tpu.matmul %15, %16, %cst_13 {dimension_numbers = #tpu.dot_dimension_numbers<[1], [1], [0], [0], [0, 0, 1, 0], [], []>} : vector<8x32xf32>, vector<8x32xf32>, vector<8x8xf32> -> vector<8x8xf32>
    %cst_14 = arith.constant 0.176776692 : f32
    %19 = vector.broadcast %cst_14 : f32 to vector<8x8xf32>
    %20 = arith.mulf %18, %19 : vector<8x8xf32>
    %cst_15 = arith.constant dense<0xFF800000> : vector<8xf32>
    %21 = vector.multi_reduction <maximumf>, %20, %cst_15 [1] : vector<8x8xf32> to vector<8xf32>
    %22 = vector.shape_cast %21 : vector<8xf32> to vector<8x1xf32>
    %23 = vector.broadcast %22 : vector<8x1xf32> to vector<8x8xf32>
    %24 = arith.subf %20, %23 : vector<8x8xf32>
    %25 = math.exp %24 : vector<8x8xf32>
    %cst_16 = arith.constant dense<0.000000e+00> : vector<8xf32>
    %26 = vector.multi_reduction <add>, %25, %cst_16 [1] : vector<8x8xf32> to vector<8xf32>
    %27 = vector.shape_cast %26 : vector<8xf32> to vector<8x1xf32>
    %28 = vector.broadcast %27 : vector<8x1xf32> to vector<8x8xf32>
    %29 = arith.divf %25, %28 : vector<8x8xf32>
    %cst_17 = arith.constant dense<0.000000e+00> : vector<8x32xf32>
    %30 = tpu.matmul %29, %17, %cst_17 {dimension_numbers = #tpu.dot_dimension_numbers<[1], [0], [0], [1], [0, 0, 1, 1], [], []>} : vector<8x8xf32>, vector<8x32xf32>, vector<8x32xf32> -> vector<8x32xf32>
    %c0_18 = arith.constant 0 : index
    %c0_19 = arith.constant 0 : index
    %c0_20 = arith.constant 0 : index
    %31 = vector.load %arg4[%c0_18, %c0_19, %c0_20] : memref<4x32x128xf32, #tpu.memory_space<vmem>>, vector<1x32x128xf32>
    %32 = vector.shape_cast %31 : vector<1x32x128xf32> to vector<32x128xf32>
    %cst_21 = arith.constant dense<0.000000e+00> : vector<8x128xf32>
    %33 = tpu.matmul %30, %32, %cst_21 {dimension_numbers = #tpu.dot_dimension_numbers<[1], [0], [0], [1], [0, 0, 1, 1], [], []>} : vector<8x32xf32>, vector<32x128xf32>, vector<8x128xf32> -> vector<8x128xf32>
    %34 = arith.addf %14, %33 : vector<8x128xf32>
    %35 = vector.extract_strided_slice %12 {offsets = [0, 32], sizes = [8, 32], strides = [1, 1]} : vector<8x384xf32> to vector<8x32xf32>
    %36 = vector.extract_strided_slice %12 {offsets = [0, 160], sizes = [8, 32], strides = [1, 1]} : vector<8x384xf32> to vector<8x32xf32>
    %37 = vector.extract_strided_slice %12 {offsets = [0, 288], sizes = [8, 32], strides = [1, 1]} : vector<8x384xf32> to vector<8x32xf32>
    %cst_22 = arith.constant dense<0.000000e+00> : vector<8x8xf32>
    %38 = tpu.matmul %35, %36, %cst_22 {dimension_numbers = #tpu.dot_dimension_numbers<[1], [1], [0], [0], [0, 0, 1, 0], [], []>} : vector<8x32xf32>, vector<8x32xf32>, vector<8x8xf32> -> vector<8x8xf32>
    %cst_23 = arith.constant 0.176776692 : f32
    %39 = vector.broadcast %cst_23 : f32 to vector<8x8xf32>
    %40 = arith.mulf %38, %39 : vector<8x8xf32>
    %cst_24 = arith.constant dense<0xFF800000> : vector<8xf32>
    %41 = vector.multi_reduction <maximumf>, %40, %cst_24 [1] : vector<8x8xf32> to vector<8xf32>
    %42 = vector.shape_cast %41 : vector<8xf32> to vector<8x1xf32>
    %43 = vector.broadcast %42 : vector<8x1xf32> to vector<8x8xf32>
    %44 = arith.subf %40, %43 : vector<8x8xf32>
    %45 = math.exp %44 : vector<8x8xf32>
    %cst_25 = arith.constant dense<0.000000e+00> : vector<8xf32>
    %46 = vector.multi_reduction <add>, %45, %cst_25 [1] : vector<8x8xf32> to vector<8xf32>
    %47 = vector.shape_cast %46 : vector<8xf32> to vector<8x1xf32>
    %48 = vector.broadcast %47 : vector<8x1xf32> to vector<8x8xf32>
    %49 = arith.divf %45, %48 : vector<8x8xf32>
    %cst_26 = arith.constant dense<0.000000e+00> : vector<8x32xf32>
    %50 = tpu.matmul %49, %37, %cst_26 {dimension_numbers = #tpu.dot_dimension_numbers<[1], [0], [0], [1], [0, 0, 1, 1], [], []>} : vector<8x8xf32>, vector<8x32xf32>, vector<8x32xf32> -> vector<8x32xf32>
    %c1_27 = arith.constant 1 : index
    %c0_28 = arith.constant 0 : index
    %c0_29 = arith.constant 0 : index
    %51 = vector.load %arg4[%c1_27, %c0_28, %c0_29] : memref<4x32x128xf32, #tpu.memory_space<vmem>>, vector<1x32x128xf32>
    %52 = vector.shape_cast %51 : vector<1x32x128xf32> to vector<32x128xf32>
    %cst_30 = arith.constant dense<0.000000e+00> : vector<8x128xf32>
    %53 = tpu.matmul %50, %52, %cst_30 {dimension_numbers = #tpu.dot_dimension_numbers<[1], [0], [0], [1], [0, 0, 1, 1], [], []>} : vector<8x32xf32>, vector<32x128xf32>, vector<8x128xf32> -> vector<8x128xf32>
    %54 = arith.addf %34, %53 : vector<8x128xf32>
    %55 = vector.extract_strided_slice %12 {offsets = [0, 64], sizes = [8, 32], strides = [1, 1]} : vector<8x384xf32> to vector<8x32xf32>
    %56 = vector.extract_strided_slice %12 {offsets = [0, 192], sizes = [8, 32], strides = [1, 1]} : vector<8x384xf32> to vector<8x32xf32>
    %57 = vector.extract_strided_slice %12 {offsets = [0, 320], sizes = [8, 32], strides = [1, 1]} : vector<8x384xf32> to vector<8x32xf32>
    %cst_31 = arith.constant dense<0.000000e+00> : vector<8x8xf32>
    %58 = tpu.matmul %55, %56, %cst_31 {dimension_numbers = #tpu.dot_dimension_numbers<[1], [1], [0], [0], [0, 0, 1, 0], [], []>} : vector<8x32xf32>, vector<8x32xf32>, vector<8x8xf32> -> vector<8x8xf32>
    %cst_32 = arith.constant 0.176776692 : f32
    %59 = vector.broadcast %cst_32 : f32 to vector<8x8xf32>
    %60 = arith.mulf %58, %59 : vector<8x8xf32>
    %cst_33 = arith.constant dense<0xFF800000> : vector<8xf32>
    %61 = vector.multi_reduction <maximumf>, %60, %cst_33 [1] : vector<8x8xf32> to vector<8xf32>
    %62 = vector.shape_cast %61 : vector<8xf32> to vector<8x1xf32>
    %63 = vector.broadcast %62 : vector<8x1xf32> to vector<8x8xf32>
    %64 = arith.subf %60, %63 : vector<8x8xf32>
    %65 = math.exp %64 : vector<8x8xf32>
    %cst_34 = arith.constant dense<0.000000e+00> : vector<8xf32>
    %66 = vector.multi_reduction <add>, %65, %cst_34 [1] : vector<8x8xf32> to vector<8xf32>
    %67 = vector.shape_cast %66 : vector<8xf32> to vector<8x1xf32>
    %68 = vector.broadcast %67 : vector<8x1xf32> to vector<8x8xf32>
    %69 = arith.divf %65, %68 : vector<8x8xf32>
    %cst_35 = arith.constant dense<0.000000e+00> : vector<8x32xf32>
    %70 = tpu.matmul %69, %57, %cst_35 {dimension_numbers = #tpu.dot_dimension_numbers<[1], [0], [0], [1], [0, 0, 1, 1], [], []>} : vector<8x8xf32>, vector<8x32xf32>, vector<8x32xf32> -> vector<8x32xf32>
    %c2_36 = arith.constant 2 : index
    %c0_37 = arith.constant 0 : index
    %c0_38 = arith.constant 0 : index
    %71 = vector.load %arg4[%c2_36, %c0_37, %c0_38] : memref<4x32x128xf32, #tpu.memory_space<vmem>>, vector<1x32x128xf32>
    %72 = vector.shape_cast %71 : vector<1x32x128xf32> to vector<32x128xf32>
    %cst_39 = arith.constant dense<0.000000e+00> : vector<8x128xf32>
    %73 = tpu.matmul %70, %72, %cst_39 {dimension_numbers = #tpu.dot_dimension_numbers<[1], [0], [0], [1], [0, 0, 1, 1], [], []>} : vector<8x32xf32>, vector<32x128xf32>, vector<8x128xf32> -> vector<8x128xf32>
    %74 = arith.addf %54, %73 : vector<8x128xf32>
    %75 = vector.extract_strided_slice %12 {offsets = [0, 96], sizes = [8, 32], strides = [1, 1]} : vector<8x384xf32> to vector<8x32xf32>
    %76 = vector.extract_strided_slice %12 {offsets = [0, 224], sizes = [8, 32], strides = [1, 1]} : vector<8x384xf32> to vector<8x32xf32>
    %77 = vector.extract_strided_slice %12 {offsets = [0, 352], sizes = [8, 32], strides = [1, 1]} : vector<8x384xf32> to vector<8x32xf32>
    %cst_40 = arith.constant dense<0.000000e+00> : vector<8x8xf32>
    %78 = tpu.matmul %75, %76, %cst_40 {dimension_numbers = #tpu.dot_dimension_numbers<[1], [1], [0], [0], [0, 0, 1, 0], [], []>} : vector<8x32xf32>, vector<8x32xf32>, vector<8x8xf32> -> vector<8x8xf32>
    %cst_41 = arith.constant 0.176776692 : f32
    %79 = vector.broadcast %cst_41 : f32 to vector<8x8xf32>
    %80 = arith.mulf %78, %79 : vector<8x8xf32>
    %cst_42 = arith.constant dense<0xFF800000> : vector<8xf32>
    %81 = vector.multi_reduction <maximumf>, %80, %cst_42 [1] : vector<8x8xf32> to vector<8xf32>
    %82 = vector.shape_cast %81 : vector<8xf32> to vector<8x1xf32>
    %83 = vector.broadcast %82 : vector<8x1xf32> to vector<8x8xf32>
    %84 = arith.subf %80, %83 : vector<8x8xf32>
    %85 = math.exp %84 : vector<8x8xf32>
    %cst_43 = arith.constant dense<0.000000e+00> : vector<8xf32>
    %86 = vector.multi_reduction <add>, %85, %cst_43 [1] : vector<8x8xf32> to vector<8xf32>
    %87 = vector.shape_cast %86 : vector<8xf32> to vector<8x1xf32>
    %88 = vector.broadcast %87 : vector<8x1xf32> to vector<8x8xf32>
    %89 = arith.divf %85, %88 : vector<8x8xf32>
    %cst_44 = arith.constant dense<0.000000e+00> : vector<8x32xf32>
    %90 = tpu.matmul %89, %77, %cst_44 {dimension_numbers = #tpu.dot_dimension_numbers<[1], [0], [0], [1], [0, 0, 1, 1], [], []>} : vector<8x8xf32>, vector<8x32xf32>, vector<8x32xf32> -> vector<8x32xf32>
    %c3_45 = arith.constant 3 : index
    %c0_46 = arith.constant 0 : index
    %c0_47 = arith.constant 0 : index
    %91 = vector.load %arg4[%c3_45, %c0_46, %c0_47] : memref<4x32x128xf32, #tpu.memory_space<vmem>>, vector<1x32x128xf32>
    %92 = vector.shape_cast %91 : vector<1x32x128xf32> to vector<32x128xf32>
    %cst_48 = arith.constant dense<0.000000e+00> : vector<8x128xf32>
    %93 = tpu.matmul %90, %92, %cst_48 {dimension_numbers = #tpu.dot_dimension_numbers<[1], [0], [0], [1], [0, 0, 1, 1], [], []>} : vector<8x32xf32>, vector<32x128xf32>, vector<8x128xf32> -> vector<8x128xf32>
    %94 = arith.addf %74, %93 : vector<8x128xf32>
    %95 = arith.addf %1, %94 : vector<8x128xf32>
    %cst_49 = arith.constant dense<0.000000e+00> : vector<8xf32>
    %96 = vector.multi_reduction <add>, %95, %cst_49 [1] : vector<8x128xf32> to vector<8xf32>
    %97 = vector.shape_cast %96 : vector<8xf32> to vector<8x1xf32>
    %cst_50 = arith.constant 1.280000e+02 : f32
    %98 = vector.broadcast %cst_50 : f32 to vector<8x1xf32>
    %99 = arith.divf %97, %98 : vector<8x1xf32>
    %100 = vector.broadcast %99 : vector<8x1xf32> to vector<8x128xf32>
    %101 = arith.subf %95, %100 : vector<8x128xf32>
    %102 = arith.mulf %101, %101 : vector<8x128xf32>
    %cst_51 = arith.constant dense<0.000000e+00> : vector<8xf32>
    %103 = vector.multi_reduction <add>, %102, %cst_51 [1] : vector<8x128xf32> to vector<8xf32>
    %104 = vector.shape_cast %103 : vector<8xf32> to vector<8x1xf32>
    %cst_52 = arith.constant 1.280000e+02 : f32
    %105 = vector.broadcast %cst_52 : f32 to vector<8x1xf32>
    %106 = arith.divf %104, %105 : vector<8x1xf32>
    %107 = vector.broadcast %99 : vector<8x1xf32> to vector<8x128xf32>
    %108 = arith.subf %95, %107 : vector<8x128xf32>
    %cst_53 = arith.constant 9.99999996E-13 : f32
    %109 = vector.broadcast %cst_53 : f32 to vector<8x1xf32>
    %110 = arith.addf %106, %109 : vector<8x1xf32>
    %111 = math.rsqrt %110 : vector<8x1xf32>
    %112 = vector.broadcast %111 : vector<8x1xf32> to vector<8x128xf32>
    %113 = arith.mulf %108, %112 : vector<8x128xf32>
    %114 = vector.broadcast %3 : vector<1x128xf32> to vector<8x128xf32>
    %115 = arith.mulf %113, %114 : vector<8x128xf32>
    %116 = vector.broadcast %4 : vector<1x128xf32> to vector<8x128xf32>
    %117 = arith.addf %115, %116 : vector<8x128xf32>
    %c0_54 = arith.constant 0 : index
    %c0_55 = arith.constant 0 : index
    %118 = vector.load %arg5[%c0_54, %c0_55] : memref<128x256xf32, #tpu.memory_space<vmem>>, vector<128x256xf32>
    %cst_56 = arith.constant dense<0.000000e+00> : vector<8x256xf32>
    %119 = tpu.matmul %117, %118, %cst_56 {dimension_numbers = #tpu.dot_dimension_numbers<[1], [0], [0], [1], [0, 0, 1, 1], [], []>} : vector<8x128xf32>, vector<128x256xf32>, vector<8x256xf32> -> vector<8x256xf32>
    %c0_57 = arith.constant 0 : index
    %c0_58 = arith.constant 0 : index
    %120 = vector.load %arg6[%c0_57, %c0_58] : memref<1x256xf32, #tpu.memory_space<vmem>>, vector<1x256xf32>
    %121 = vector.broadcast %120 : vector<1x256xf32> to vector<8x256xf32>
    %122 = arith.addf %119, %121 : vector<8x256xf32>
    %cst_59 = arith.constant 5.000000e-01 : f32
    %123 = vector.broadcast %cst_59 : f32 to vector<8x256xf32>
    %124 = arith.mulf %123, %122 : vector<8x256xf32>
    %cst_60 = arith.constant 4.471500e-02 : f32
    %125 = vector.broadcast %cst_60 : f32 to vector<8x256xf32>
    %126 = arith.mulf %125, %122 : vector<8x256xf32>
    %127 = arith.mulf %126, %122 : vector<8x256xf32>
    %128 = arith.mulf %127, %122 : vector<8x256xf32>
    %129 = arith.addf %122, %128 : vector<8x256xf32>
    %cst_61 = arith.constant 0.797884583 : f32
    %130 = vector.broadcast %cst_61 : f32 to vector<8x256xf32>
    %131 = arith.mulf %130, %129 : vector<8x256xf32>
    %132 = math.tanh %131 : vector<8x256xf32>
    %cst_62 = arith.constant 1.000000e+00 : f32
    %133 = vector.broadcast %cst_62 : f32 to vector<8x256xf32>
    %134 = arith.addf %133, %132 : vector<8x256xf32>
    %135 = arith.mulf %124, %134 : vector<8x256xf32>
    %c0_63 = arith.constant 0 : index
    %c0_64 = arith.constant 0 : index
    %136 = vector.load %arg7[%c0_63, %c0_64] : memref<256x128xf32, #tpu.memory_space<vmem>>, vector<256x128xf32>
    %cst_65 = arith.constant dense<0.000000e+00> : vector<8x128xf32>
    %137 = tpu.matmul %135, %136, %cst_65 {dimension_numbers = #tpu.dot_dimension_numbers<[1], [0], [0], [1], [0, 0, 1, 1], [], []>} : vector<8x256xf32>, vector<256x128xf32>, vector<8x128xf32> -> vector<8x128xf32>
    %138 = vector.broadcast %5 : vector<1x128xf32> to vector<8x128xf32>
    %139 = arith.addf %137, %138 : vector<8x128xf32>
    %140 = arith.addf %139, %117 : vector<8x128xf32>
    %cst_66 = arith.constant dense<0.000000e+00> : vector<8xf32>
    %141 = vector.multi_reduction <add>, %140, %cst_66 [1] : vector<8x128xf32> to vector<8xf32>
    %142 = vector.shape_cast %141 : vector<8xf32> to vector<8x1xf32>
    %cst_67 = arith.constant 1.280000e+02 : f32
    %143 = vector.broadcast %cst_67 : f32 to vector<8x1xf32>
    %144 = arith.divf %142, %143 : vector<8x1xf32>
    %145 = vector.broadcast %144 : vector<8x1xf32> to vector<8x128xf32>
    %146 = arith.subf %140, %145 : vector<8x128xf32>
    %147 = arith.mulf %146, %146 : vector<8x128xf32>
    %cst_68 = arith.constant dense<0.000000e+00> : vector<8xf32>
    %148 = vector.multi_reduction <add>, %147, %cst_68 [1] : vector<8x128xf32> to vector<8xf32>
    %149 = vector.shape_cast %148 : vector<8xf32> to vector<8x1xf32>
    %cst_69 = arith.constant 1.280000e+02 : f32
    %150 = vector.broadcast %cst_69 : f32 to vector<8x1xf32>
    %151 = arith.divf %149, %150 : vector<8x1xf32>
    %152 = vector.broadcast %144 : vector<8x1xf32> to vector<8x128xf32>
    %153 = arith.subf %140, %152 : vector<8x128xf32>
    %cst_70 = arith.constant 9.99999996E-13 : f32
    %154 = vector.broadcast %cst_70 : f32 to vector<8x1xf32>
    %155 = arith.addf %151, %154 : vector<8x1xf32>
    %156 = math.rsqrt %155 : vector<8x1xf32>
    %157 = vector.broadcast %156 : vector<8x1xf32> to vector<8x128xf32>
    %158 = arith.mulf %153, %157 : vector<8x128xf32>
    %159 = vector.broadcast %6 : vector<1x128xf32> to vector<8x128xf32>
    %160 = arith.mulf %158, %159 : vector<8x128xf32>
    %161 = vector.broadcast %7 : vector<1x128xf32> to vector<8x128xf32>
    %162 = arith.addf %160, %161 : vector<8x128xf32>
    %c0_71 = arith.constant 0 : index
    %c0_72 = arith.constant 0 : index
    %c0_73 = arith.constant 0 : index
    %163 = vector.load %arg9[%c0_71, %c0_72, %c0_73] : memref<1x8x128xf32, #tpu.memory_space<vmem>>, vector<1x8x128xf32>
    %164 = vector.shape_cast %163 : vector<1x8x128xf32> to vector<8x128xf32>
    %165 = vector.shape_cast %162 : vector<8x128xf32> to vector<1x8x128xf32>
    tpu.vector_store %arg9[%c0_71, %c0_72, %c0_73], %165 {strides = array<i32>} : memref<1x8x128xf32, #tpu.memory_space<vmem>>, vector<1x8x128xf32>,
    return
  }
  func.func @transform_0(%arg0: i32) -> (i32, i32, i32) {
    %c0_i32 = arith.constant 0 : i32
    %c0_i32_0 = arith.constant 0 : i32
    %c0_i32_1 = arith.constant 0 : i32
    return %arg0, %c0_i32, %c0_i32_0 : i32, i32, i32
  }
  func.func @transform_1(%arg0: i32) -> (i32, i32) {
    %c0_i32 = arith.constant 0 : i32
    %c0_i32_0 = arith.constant 0 : i32
    %c0_i32_1 = arith.constant 0 : i32
    return %c0_i32, %c0_i32_0 : i32, i32
  }
  func.func @transform_2(%arg0: i32) -> (i32, i32) {
    %c0_i32 = arith.constant 0 : i32
    %c0_i32_0 = arith.constant 0 : i32
    %c0_i32_1 = arith.constant 0 : i32
    return %c0_i32, %c0_i32_0 : i32, i32
  }
  func.func @transform_3(%arg0: i32) -> (i32, i32, i32) {
    %c0_i32 = arith.constant 0 : i32
    %c0_i32_0 = arith.constant 0 : i32
    %c0_i32_1 = arith.constant 0 : i32
    %c0_i32_2 = arith.constant 0 : i32
    return %c0_i32, %c0_i32_0, %c0_i32_1 : i32, i32, i32
  }
  func.func @transform_4(%arg0: i32) -> (i32, i32) {
    %c0_i32 = arith.constant 0 : i32
    %c0_i32_0 = arith.constant 0 : i32
    %c0_i32_1 = arith.constant 0 : i32
    return %c0_i32, %c0_i32_0 : i32, i32
  }
  func.func @transform_5(%arg0: i32) -> (i32, i32) {
    %c0_i32 = arith.constant 0 : i32
    %c0_i32_0 = arith.constant 0 : i32
    %c0_i32_1 = arith.constant 0 : i32
    return %c0_i32, %c0_i32_0 : i32, i32
  }
  func.func @transform_6(%arg0: i32) -> (i32, i32) {
    %c0_i32 = arith.constant 0 : i32
    %c0_i32_0 = arith.constant 0 : i32
    %c0_i32_1 = arith.constant 0 : i32
    return %c0_i32, %c0_i32_0 : i32, i32
  }
  func.func @transform_7(%arg0: i32) -> (i32, i32) {
    %c0_i32 = arith.constant 0 : i32
    %c0_i32_0 = arith.constant 0 : i32
    %c0_i32_1 = arith.constant 0 : i32
    return %c0_i32, %c0_i32_0 : i32, i32
  }
  func.func @transform_8(%arg0: i32) -> (i32, i32, i32) {
    %c0_i32 = arith.constant 0 : i32
    %c0_i32_0 = arith.constant 0 : i32
    %c0_i32_1 = arith.constant 0 : i32
    return %arg0, %c0_i32, %c0_i32_0 : i32, i32, i32
  }
}

</mosaic_0001>

<bundles_post_ra>
// kernel: tpu_custom_call.1
= control target key start
LH: loop header
LB: loop body
LE: loop exit
PB: predicated region body
PF: predicated region fallthrough
CT: control target
= control target key end

     0   :  { %s3206_s0 = inlined_call_operand.hbm [shape: f32[2,8,128], index: 0, kind: input, shape index: {}]   ;;  %s3207_s1 = inlined_call_operand.hbm [shape: f32[128,384], index: 1, kind: input, shape index: {}]   ;;  %s3208_s2 = inlined_call_operand.vmem [shape: f32[1,384], index: 2, kind: input, shape index: {}]   ;;  %s3209_s3 = inlined_call_operand.hbm [shape: f32[4,32,128], index: 3, kind: input, shape index: {}]   ;;  %s3210_s4 = inlined_call_operand.hbm [shape: f32[128,256], index: 4, kind: input, shape index: {}]   ;;  %s3211_s5 = inlined_call_operand.vmem [shape: f32[1,256], index: 5, kind: input, shape index: {}]   ;;  %s3212_s6 = inlined_call_operand.hbm [shape: f32[256,128], index: 6, kind: input, shape index: {}]   ;;  %s3213_s7 = inlined_call_operand.vmem [shape: f32[6,128], index: 7, kind: input, shape index: {}]   ;;  %s3214_s8 = inlined_call_operand.hbm [shape: f32[2,8,128], index: 8, kind: output, shape index: {}]  }
   0x1   :  { %3218 = sst [smem:[#allocation16_spill]] %s3207_s1 }
   0x2   :  { %13 = vsyncpa [#allocation3], 0 }
   0x3   :  { %15 = vsyncpa [#allocation3 + $0x1], 0 }
   0x4   :  { %16 = vsyncpa [#allocation6], 0 }
   0x5   :  { %17 = vsyncpa [#allocation9], 0 }
   0x6   :  { %18 = vsyncpa [#allocation4], 0 }
   0x7   :  { %20 = vsyncpa [#allocation4 + $0x1], 0  ;;  %s2777_s27 = smov 0   ;;  %s2779_s28 = smov 0  }
   0x8   :  { %s2781_s29 = smov 0   ;;  %s2783_s30 = smov 0  }
   0x9 LB: > { %s2714_s9 = smov [#allocation5]   ;;  %s2798_s11 = sadd.s32 4294967295, %s2712_s30   ;;  %s2712_s30 = sphi %s2783_s30, %s3240_s30   ;;  %s2708_s29 = sphi %s2781_s29, %s3239_s29   ;;  %s2704_s28 = sphi %s2779_s28, %s3238_s28   ;;  %s2700_s27 = sphi %s2777_s27, %s3237_s27  }
   0xa   : > { %s242_s10 = sshll.u32 %s2714_s9, 4  ;;  %p1981_p0 = scmp.ge.s32.totalorder %s2712_s30, 1  ;;  %s2803_s10 = int_to_ptr.vmem [resolvable:$true] %s242_s10 }
   0xb   : > { %p3215_p1 = scmp.eq.s32.totalorder %s2798_s11, 0  ;;  %p230_p2 = scmp.lt.s32.totalorder %s2712_s30, 3 }
   0xc   : > { %s2715_s13 = smov [#allocation8]   ;;  %s2716_s16 = smov [#allocation7]  }
   0xd   : > { %p2805_p3 = pnand %p1981_p0, %p230_p2  ;;  %s271_s14 = sshll.u32 %s2715_s13, 4  ;;  %s2818_s14 = int_to_ptr.vmem [resolvable:$true] %s271_s14 }
   0xe   : > { %s2820_s17 = sshll.u32 %s2716_s16, 4  ;;  %s3221_s1 = sld [smem:[#allocation16_spill]]  ;;  %s259_s17 = int_to_ptr.vmem [resolvable:$true] %s2820_s17 }
   0xf   : > { %s3219_s12 = scalar_select %p2805_p3, 1, 0 }
  0x10   : > { %p2393_p5 = pneg %p2805_p3 }
  0x12   : > { %p2814_p6 = pnand %p2393_p5, %p3215_p1 }
  0x14   : > { %s2496_s20 = scalar_lea.hbm %s3221_s1, 6144  ;;  %p2830_p8 = pneg %p2814_p6 }
  0x15   : > { %p2497_p7 = scmp.ne.s32.totalorder %s3221_s1, %s2496_s20  ;;  %p2503_p11 = scmp.lt.u32.totalorder %s2496_s20, %s3221_s1 }
  0x17   : > { %p2499_p9 = pnand %p2830_p8, %p2497_p7 }
  0x19   : > { %p2500_p10 = pneg %p2499_p9 }
  0x1b   : > { %p2505_p12 = pnand %p2503_p11, %p2500_p10 }
  0x1d   : > { %2508 = shalt.err (!%p2505_p12)
}
  0x1e   : > { %s2509_s26 = scalar_lea.vmem %s2803_s10, 6144  ;;  %p2517_p5 = scmp.lt.s32.totalorder %s2803_s10, %s2803_s10 }
  0x1f   : > { %p2510_p13 = scmp.ne.s32.totalorder %s2803_s10, %s2509_s26  ;;  %p2518_p4 = scmp.lt.s32.totalorder %s2509_s26, %s2509_s26 }
  0x21   : > { %p2512_p0 = pnand %p2510_p13, %p2830_p8  ;;  %p2519_p7 = por %p2518_p4, %p2517_p5 }
  0x23   : > { %p2513_p2 = pneg %p2512_p0 }
  0x25   : > { %p2520_p9 = pnand %p2519_p7, %p2513_p2 }
  0x27   : > { %2523 = shalt.err (!%p2520_p9)
}
  0x28   : > { %s2717_s9 = smov 384   ;;  %s2718_s13 = smov 24  }
  0x29   : > { %2396 = dma.hbm_to_vmem [thread:$0]  (!%p2814_p6), %s3221_s1, 6144, %s2803_s10, [#allocation6], %s2717_s9, %s2717_s9, %s2718_s13  }
  0x2a   : > { %s2524_s21 = scalar_lea.hbm %s3210_s4, 4096 }
  0x2b   : > { %p2525_p4 = scmp.ne.s32.totalorder %s3210_s4, %s2524_s21  ;;  %p2531_p12 = scmp.lt.u32.totalorder %s2524_s21, %s3210_s4 }
  0x2d   : > { %p2527_p10 = pnand %p2525_p4, %p2830_p8 }
  0x2f   : > { %p2528_p11 = pneg %p2527_p10 }
  0x31   : > { %p2533_p13 = pnand %p2531_p12, %p2528_p11 }
  0x33   : > { %2536 = shalt.err (!%p2533_p13)
}
  0x34   : > { %s2537_s10 = scalar_lea.vmem %s2818_s14, 4096  ;;  %p2545_p7 = scmp.lt.s32.totalorder %s2818_s14, %s2818_s14 }
  0x35   : > { %p2538_p0 = scmp.ne.s32.totalorder %s2818_s14, %s2537_s10  ;;  %p2546_p9 = scmp.lt.s32.totalorder %s2537_s10, %s2537_s10 }
  0x37   : > { %p2540_p2 = pnand %p2538_p0, %p2830_p8  ;;  %p2547_p4 = por %p2546_p9, %p2545_p7 }
  0x39   : > { %p2541_p5 = pneg %p2540_p2 }
  0x3b   : > { %p2548_p10 = pnand %p2547_p4, %p2541_p5 }
  0x3d   : > { %2551 = shalt.err (!%p2548_p10)
}
  0x3e   : > { %s2719_s9 = smov 256   ;;  %s2720_s13 = smov 16  }
  0x3f   : > { %2402 = dma.hbm_to_vmem [thread:$0]  (!%p2814_p6), %s3210_s4, 4096, %s2818_s14, [#allocation9], %s2719_s9, %s2719_s9, %s2720_s13  }
  0x40   : > { %s2552_s21 = scalar_lea.hbm %s3209_s3, 2048 }
  0x41   : > { %p2553_p11 = scmp.ne.s32.totalorder %s3209_s3, %s2552_s21  ;;  %p2559_p0 = scmp.lt.u32.totalorder %s2552_s21, %s3209_s3 }
  0x43   : > { %p2555_p12 = pnand %p2553_p11, %p2830_p8 }
  0x45   : > { %p2556_p13 = pneg %p2555_p12 }
  0x47   : > { %p2561_p2 = pnand %p2559_p0, %p2556_p13 }
  0x49   : > { %2564 = shalt.err (!%p2561_p2)
}
  0x4a   : > { %s2565_s10 = scalar_lea.vmem %s259_s17, 2048  ;;  %p2573_p4 = scmp.lt.s32.totalorder %s259_s17, %s259_s17 }
  0x4b   : > { %p2566_p5 = scmp.ne.s32.totalorder %s259_s17, %s2565_s10  ;;  %p2574_p10 = scmp.lt.s32.totalorder %s2565_s10, %s2565_s10 }
  0x4d   : > { %p2568_p7 = pnand %p2566_p5, %p2830_p8  ;;  %p2575_p1 = por %p2574_p10, %p2573_p4 }
  0x4f   : > { %p2569_p9 = pneg %p2568_p7 }
  0x51   : > { %p2576_p3 = pnand %p2575_p1, %p2569_p9 }
  0x53   : > { %2579 = shalt.err (!%p2576_p3)
}
  0x54   : > { %s2721_s14 = smov 128   ;;  %s2722_s9 = smov 8  }
  0x55   : > { %2399 = dma.hbm_to_vmem [thread:$0]  (!%p2814_p6), %s3209_s3, 2048, %s259_s17, [#allocation6], %s2721_s14, %s2721_s14, %s2722_s9  }
  0x56   : > { %s2723_s18 = smov [#allocation10]   ;;  %s2580_s22 = scalar_lea.hbm %s3212_s6, 4096 }
  0x57   : > { %s287_s19 = sshll.u32 %s2723_s18, 4  ;;  %p2581_p1 = scmp.ne.s32.totalorder %s3212_s6, %s2580_s22  ;;  %s288_s19 = int_to_ptr.vmem [resolvable:$true] %s287_s19 }
  0x58   : > { %p2587_p12 = scmp.lt.u32.totalorder %s2580_s22, %s3212_s6 }
  0x59   : > { %p2583_p3 = pnand %p2581_p1, %p2830_p8 }
  0x5b   : > { %p2584_p11 = pneg %p2583_p3 }
  0x5d   : > { %p2589_p13 = pnand %p2587_p12, %p2584_p11 }
  0x5f   : > { %2592 = shalt.err (!%p2589_p13)
}
  0x60   : > { %s2593_s17 = scalar_lea.vmem %s288_s19, 4096  ;;  %p2601_p7 = scmp.lt.s32.totalorder %s288_s19, %s288_s19 }
  0x61   : > { %p2594_p0 = scmp.ne.s32.totalorder %s288_s19, %s2593_s17  ;;  %p2602_p9 = scmp.lt.s32.totalorder %s2593_s17, %s2593_s17 }
  0x63   : > { %p2596_p2 = pnand %p2594_p0, %p2830_p8  ;;  %p2603_p4 = por %p2602_p9, %p2601_p7 }
  0x65   : > { %p2597_p5 = pneg %p2596_p2 }
  0x67   : > { %p2604_p10 = pnand %p2603_p4, %p2597_p5 }
  0x69   : > { %2607 = shalt.err (!%p2604_p10)
}
  0x6a   : > { %2405 = dma.hbm_to_vmem [thread:$0]  (!%p2814_p6), %s3212_s6, 4096, %s288_s19, [#allocation9], %s2721_s14, %s2721_s14, %s2722_s9  }
  0x6b   : > { %s1980_s23 = sadd.s32 4294967294, %s2712_s30   ;;  %s2913_s15 = sadd.s32 1, %s2712_s30  }
  0x6c   : > { %s30_s18 = ssub.s32 %s2712_s30, %s2913_s15  ;;  %s33_s20 = sadd.s32 1, %s2708_s29 }
  0x6d   : > { %p31_p8 = scmp.eq.s32.totalorder %s30_s18, 0  ;;  %p40_p1 = scmp.ne.s32.totalorder %s2708_s29, %s2704_s28 }
  0x6e   : > { %p41_p3 = scmp.eq.s32.totalorder %s2712_s30, 0  ;;  %p46_p11 = scmp.ne.s32.totalorder %s2704_s28, %s2700_s27 }
  0x6f   : > { %s2924_s21 = scalar_select %p31_p8, %s2708_s29, %s33_s20  }
  0x70   : > { %p2926_p12 = por %p41_p3, %p40_p1  ;;  %p3224_p13 = scmp.eq.s32.totalorder %s2798_s11, 0 }
  0x71   : > { %p217_p0 = scmp.eq.s32.totalorder %s2798_s11, 1  ;;  %p223_p2 = scmp.eq.s32.totalorder %s1980_s23, 1 }
  0x72   : > { %p2932_p6 = por %p3224_p13, %p46_p11  ;;  %p2418_p5 = scmp.lt.s32.totalorder %s2712_s30, 2 }
  0x73   : > { %s304_s9 = sand.u32 1, %s2708_s29   ;;  %p2939_p7 = por %p217_p0, %p40_p1 }
  0x74   : > { %p2943_p9 = por %p223_p2, %p46_p11  ;;  %s1987_s25 = sshll.u32 %s304_s9, 3 }
  0x75   : > { %s3226_s19 = scalar_select %p2939_p7, 1, 0 }
  0x76   : > { %s3227_s24 = scalar_select %p2943_p9, 1, 0 }
  0x77   : > { %s1988_s26 = sshll.u32 %s2712_s30, 7  ;;  %s308_s16 = scalar_lea.vmem [#allocation2], %s1987_s25 }
  0x78   : > { %s2951_s13 = scalar_lea.hbm %s3206_s0, %s1988_s26  ;;  %s315_s23 = sshll.u32 %s308_s16, 4  ;;  %s2953_s23 = int_to_ptr.vmem [resolvable:$true] %s315_s23 }
  0x79   : > { %p2957_p4 = pnand %p2418_p5, %p2926_p12  ;;  %s305_s20 = scalar_lea.sflag [#allocation3], %s304_s9 }
  0x7a   : > { %s2608_s1 = scalar_lea.hbm %s2951_s13, 128  ;;  %s2613_s10 = scalar_lea.hbm %s3206_s0, 256 }
  0x7b   : > { %p2609_p10 = scmp.ne.s32.totalorder %s2951_s13, %s2608_s1  ;;  %p2610_p8 = pneg %p2957_p4 }
  0x7c   : > { %p2614_p11 = scmp.lt.u32.totalorder %s2951_s13, %s3206_s0  ;;  %p2615_p12 = scmp.lt.u32.totalorder %s2613_s10, %s2608_s1 }
  0x7d   : > { %p2611_p1 = pnand %p2610_p8, %p2609_p10  ;;  %p2617_p0 = scmp.lt.u32.totalorder %s2608_s1, %s2951_s13 }
  0x7e   : > { %p2616_p13 = por %p2615_p12, %p2614_p11 }
  0x7f   : > { %p2612_p3 = pneg %p2611_p1 }
  0x80   : > { %p2618_p2 = por %p2617_p0, %p2616_p13 }
  0x82   : > { %p2619_p5 = pnand %p2618_p2, %p2612_p3 }
  0x84   : > { %2622 = shalt.err (!%p2619_p5)
}
  0x85   : > { %s2623_s9 = scalar_lea.vmem %s2953_s23, 128  ;;  %s2724_s16 = smov [#allocation2]  }
  0x86   : > { %p2624_p10 = scmp.ne.s32.totalorder %s2953_s23, %s2623_s9  ;;  %s2628_s25 = sshll.u32 %s2724_s16, 4  ;;  %s2629_s25 = int_to_ptr.vmem [resolvable:$false] %s2628_s25 }
  0x87   : > { %s2630_s26 = scalar_lea.vmem %s2629_s25, 256  ;;  %p2631_p7 = scmp.lt.s32.totalorder %s2953_s23, %s2629_s25 }
  0x88   : > { %p2626_p1 = pnand %p2624_p10, %p2610_p8  ;;  %p2632_p11 = scmp.lt.s32.totalorder %s2630_s26, %s2623_s9 }
  0x8a   : > { %p2627_p9 = pneg %p2626_p1  ;;  %p2633_p12 = por %p2632_p11, %p2631_p7 }
  0x8c   : > { %p2634_p13 = pnand %p2633_p12, %p2627_p9 }
  0x8e   : > { %2637 = shalt.err (!%p2634_p13)
}
  0x8f   : > { %2409 = dma.hbm_to_vmem [thread:$0]  (!%p2957_p4), %s2951_s13, 128, %s2953_s23, %s305_s20  }
  0x90   : > { %p3229_p3 = scmp.ne.s32.totalorder %s3219_s12, 0 }
  0x91   : > { %s2989_s1 = sand.u32 (!%p3229_p3), 1, %s2704_s28  }
  0x92   : > { %324 = sbr.rel (%p3229_p3) target bundleno = 4061 (0xfdd), region = 52  ;;  %s1990_s10 = sshll.u32 (!%p3229_p3), %s2989_s1, 3 }
  0x93   : > { %s327_s22 = scalar_lea.sflag (!%p3229_p3), [#allocation3], %s2989_s1  ;;  %s2995_s17 = scalar_lea.vmem (!%p3229_p3), [#allocation2], %s1990_s10 }
  0x99   : > { %2683 = dma.done.wait (%p2932_p6), %s327_s22, 128  }
  0x9a   : > { %2685 = vsyncadd (%p2932_p6), %s327_s22, 4294967168  ;;  %p3230_p7 = scmp.eq.s32.totalorder %s2798_s11, 0 }
  0x9c   : > { %2687 = dma.done.wait (%p3230_p7), [#allocation6], 8192   ;;  %p3231_p9 = pmov %p3230_p7 }
  0x9d   : > { %p3232_p4 = pmov %p3230_p7 }
  0x9e   : > { %2689 = vsyncadd (%p3231_p9), [#allocation6], 4294959104 }
  0x9f   : > { %2691 = dma.done.wait (%p3232_p4), [#allocation9], 8192   ;;  %p3233_p8 = pmov %p3232_p4 }
  0xa0   : > { %v2725_v0 = vmov 0.0   ;;  %v2726_v1 = vmov 0.0|0.0   ;;  %v387_v2 = vld [vmem:[#allocation5 + $0x8] sm:$0xff]  ;;  %v390_v3 = vld [vmem:[#allocation5 + $0x20] sm:$0xff]  ;;  %v389_v6 = vld [vmem:[#allocation5 + $0x18] sm:$0xff]  ;;  %vm2727_vm0 = vmmov 0  }
  0xa1   : > { %2693 = vsyncadd (%p3233_p8), [#allocation9], 4294959104  ;;  %515 = vmatprep.mubr.f32.mxu0 %v2725_v0  ;;  %2261 = vmatprep.subr.bf16.mxu1 %v2726_v1  ;;  %v386_v4 = vld [vmem:[#allocation5] sm:$0xff]  ;;  %v2229_v5 = vpack.c.bf16 %v390_v3, %v387_v2  ;;  %v393_v7 = vld [vmem:[#allocation5 + $0x38] sm:$0xff]  ;;  %vm596_vm1 = vcmask 261120   ;;  %s2728_s13 = smov 96  }
  0xa2   : > { %v396_v8 = vld [vmem:[#allocation5 + $0x50] sm:$0xff]  ;;  %v2231_v9 = vpack.c.bf16 %v389_v6, %v386_v4  ;;  %v395_v12 = vld [vmem:[#allocation5 + $0x48] sm:$0xff]  ;;  %v402_v14 = vld [vmem:[#allocation5 + $0x80] sm:$0xff]  ;;  %2142 = vmatprep.mubr.msk.f32.mxu1 %vm2727_vm0, %v2725_v0  ;;  %vm674_vm2 = vcmask 64512   ;;  %s2729_s23 = smov 64   ;;  %s2730_s18 = smov 32  }
  0xa3   : > { %v2233_v10 = vpack.c.bf16 %v396_v8, %v393_v7  ;;  %v392_v11 = vld [vmem:[#allocation5 + $0x30] sm:$0xff]  ;;  %v399_v13 = vld [vmem:[#allocation5 + $0x68] sm:$0xff]  ;;  %2230 = vmatprep.subr.bf16.mxu0 %v2229_v5  ;;  %v398_v17 = vld [vmem:[#allocation5 + $0x60] sm:$0xff]  ;;  %s2019_s16 = sshll.u32 %s2798_s11, 7  ;;  %s378_s25 = scalar_lea.vmem [#allocation11], %s1990_s10 }
  0xa4   : > { %2232 = vmatpush1.bf16.msra.mxu0 %v2231_v9  ;;  %v2235_v15 = vpack.c.bf16 %v395_v12, %v392_v11  ;;  %v2237_v16 = vpack.c.bf16 %v402_v14, %v399_v13  ;;  %v401_v18 = vld [vmem:[#allocation5 + $0x78] sm:$0xff]  ;;  %v408_v20 = vld [vmem:[#allocation5 + $0xb0] sm:$0xff]  ;;  %v407_v24 = vld [vmem:[#allocation5 + $0xa8] sm:$0xff]  ;;  %v436_v13 = vlaneseq  ;;  %s1872_s26 = sshll.u32 %s378_s25, 4  ;;  %s3162_s12 = scalar_lea.hbm %s3214_s8, %s2019_s16  ;;  %s3164_s26 = int_to_ptr.vmem [resolvable:$true] %s1872_s26 }
  0xa5   : > { %2234 = vmatprep.subr.bf16.mxu0 %v2233_v10  ;;  %v405_v19 = vld [vmem:[#allocation5 + $0x98] sm:$0xff]  ;;  %v2239_v21 = vpack.c.bf16 %v401_v18, %v398_v17  ;;  %v404_v23 = vld [vmem:[#allocation5 + $0x90] sm:$0xff]  ;;  %v411_v25 = vld [vmem:[#allocation5 + $0xc8] sm:$0xff]  ;;  %s1859_s14 = scalar_lea.sflag [#allocation4], %s2989_s1  ;;  %p3234_p0 = scmp.ne.s32.totalorder %s3226_s19, 0 }
  0xa6   : > { %v2241_v22 = vpack.c.bf16 %v408_v20, %v405_v19  ;;  %v414_v26 = vld [vmem:[#allocation5 + $0xe0] sm:$0xff]  ;;  %v388_v27 = vld [vmem:[#allocation5 + $0x10] sm:$0xff]  ;;  %v391_v28 = vld [vmem:[#allocation5 + $0x28] sm:$0xff]  ;;  %v2243_v30 = vpack.c.bf16 %v407_v24, %v404_v23  ;;  %v3031_v14 = vshrl.u32 %v436_v13, 7  ;;  %s2731_s11 = smov [#allocation11]  }
  0xa7   : > { %v394_v29 = vld [vmem:[#allocation5 + $0x40] sm:$0xff]  ;;  %v2262_v31 = vpack.c.bf16 %v391_v28, %v388_v27  ;;  %v397_v32 = vld [vmem:[#allocation5 + $0x58] sm:$0xff]  ;;  %v2245_v33 = vpack.c.bf16 %v414_v26, %v411_v25  ;;  %v420_v37 = vld [vmem:[#allocation5 + $0x110] sm:$0xff]  ;;  %s2642_s10 = sshll.u32 %s2731_s11, 4  ;;  %s2643_s10 = int_to_ptr.vmem [resolvable:$false] %s2642_s10 }
  0xa8   : > { %2236 = vmatpush1.bf16.msra.mxu0 %v2235_v15  ;;  %v410_v34 = vld [vmem:[#allocation5 + $0xc0] sm:$0xff]  ;;  %v413_v35 = vld [vmem:[#allocation5 + $0xd8] sm:$0xff]  ;;  %v2265_v38 = vpack.c.bf16 %v397_v32, %v394_v29  ;;  %v400_v39 = vld [vmem:[#allocation5 + $0x70] sm:$0xff]  ;;  %v442_v15 = vsub.s32 1, %v3031_v14  ;;  %v438_v17 = vsub.s32 0, %v3031_v14  ;;  %v446_v24 = vsub.s32 2, %v3031_v14  ;;  %p2645_p10 = scmp.lt.s32.totalorder %s3164_s26, %s2643_s10 }
  0xa9   : > { %2238 = vmatprep.subr.bf16.mxu0 %v2237_v16  ;;  %v417_v36 = vld [vmem:[#allocation5 + $0xf8] sm:$0xff]  ;;  %2263 = vmatpush3.bf16.msra.mxu1 %v2262_v31  ;;  %v403_v40 = vld [vmem:[#allocation5 + $0x88] sm:$0xff]  ;;  %v2247_v41 = vpack.c.bf16 %v413_v35, %v410_v34  ;;  %v416_v43 = vld [vmem:[#allocation5 + $0xf0] sm:$0xff] }
  0xaa   : > { %2264 = vmatprep.subr.bf16.mxu1 %v2726_v1  ;;  %v2249_v42 = vpack.c.bf16 %v420_v37, %v417_v36  ;;  %v419_v44 = vld [vmem:[#allocation5 + $0x108] sm:$0xff]  ;;  %v426_v46 = vld [vmem:[#allocation5 + $0x140] sm:$0xff]  ;;  %v2268_v47 = vpack.c.bf16 %v403_v40, %v400_v39  ;;  %v409_v49 = vld [vmem:[#allocation5 + $0xb8] sm:$0xff] }
  0xab   : > { %v423_v45 = vld [vmem:[#allocation5 + $0x128] sm:$0xff]  ;;  %v406_v48 = vld [vmem:[#allocation5 + $0xa0] sm:$0xff]  ;;  %v2251_v50 = vpack.c.bf16 %v419_v44, %v416_v43  ;;  %v425_v53 = vld [vmem:[#allocation5 + $0x138] sm:$0xff] }
  0xac   : > { %2240 = vmatpush1.bf16.msra.mxu0 %v2239_v21  ;;  %v2253_v51 = vpack.c.bf16 %v426_v46, %v423_v45  ;;  %v422_v52 = vld [vmem:[#allocation5 + $0x120] sm:$0xff]  ;;  %v429_v54 = vld [vmem:[#allocation5 + $0x158] sm:$0xff]  ;;  %v432_v55 = vld [vmem:[#allocation5 + $0x170] sm:$0xff]  ;;  %v2271_v56 = vpack.c.bf16 %v409_v49, %v406_v48 }
  0xad   : > { %2242 = vmatprep.subr.bf16.mxu0 %v2241_v22  ;;  %2266 = vmatpush3.bf16.msra.mxu1 %v2265_v38  ;;  %v412_v57 = vld [vmem:[#allocation5 + $0xd0] sm:$0xff]  ;;  %v415_v58 = vld [vmem:[#allocation5 + $0xe8] sm:$0xff]  ;;  %v2255_v59 = vpack.c.bf16 %v425_v53, %v422_v52  ;;  %v2257_v60 = vpack.c.bf16 %v432_v55, %v429_v54  ;;  %v418_v2 = vld [vmem:[#allocation5 + $0x100] sm:$0xff] }
  0xae   : > { %2267 = vmatprep.subr.bf16.mxu1 %v2726_v1  ;;  %v428_v61 = vld [vmem:[#allocation5 + $0x150] sm:$0xff]  ;;  %v431_v62 = vld [vmem:[#allocation5 + $0x168] sm:$0xff]  ;;  %v2274_v63 = vpack.c.bf16 %v415_v58, %v412_v57  ;;  %v421_v3 = vld [vmem:[#allocation5 + $0x118] sm:$0xff] }
  0xaf   : > { %v2259_v4 = vpack.c.bf16 %v431_v62, %v428_v61  ;;  %v2277_v5 = vpack.c.bf16 %v421_v3, %v418_v2  ;;  %v424_v6 = vld [vmem:[#allocation5 + $0x130] sm:$0xff]  ;;  %v427_v7 = vld [vmem:[#allocation5 + $0x148] sm:$0xff]  ;;  %v430_v10 = vld [vmem:[#allocation5 + $0x160] sm:$0xff] }
  0xb0   : > { %2244 = vmatpush1.bf16.msra.mxu0 %v2243_v30  ;;  %v3017_v8 = vld [vmem:[%s2995_s17] sm:$0xff]  ;;  %v2280_v9 = vpack.c.bf16 %v427_v7, %v424_v6  ;;  %v759_v38 = vld [vmem:[#allocation7] sm:$0xff]  ;;  %v760_v39 = vld [vmem:[#allocation7 + $0x8] sm:$0xff] }
  0xb1   : > { %2246 = vmatprep.subr.bf16.mxu0 %v2245_v33  ;;  %2269 = vmatpush3.bf16.msra.mxu1 %v2268_v47  ;;  %v433_v11 = vld [vmem:[#allocation5 + $0x178] sm:$0xff]  ;;  %v434_v16 = vld [vmem:[%s3208_s2] sm:$0x7]  ;;  %v1005_v61 = vld [vmem:[#allocation7 + $0x20] sm:$0xff] }
  0xb2   : > { %2270 = vmatprep.subr.bf16.mxu1 %v2726_v1  ;;  %v2283_v12 = vpack.c.bf16 %v433_v11, %v430_v10  ;;  %v443_v18 = vrot.slane %v434_v16, %v442_v15  ;;  %v439_v20 = vrot.slane %v434_v16, %v438_v17  ;;  %v447_v25 = vrot.slane %v434_v16, %v446_v24  ;;  %v761_v40 = vld [vmem:[#allocation7 + $0x10] sm:$0xff]  ;;  %v1006_v62 = vld [vmem:[#allocation7 + $0x28] sm:$0xff]  ;;  %v1008_v3 = vld [vmem:[#allocation7 + $0x38] sm:$0xff] }
  0xb3   : > { %v2292_v2 = vpack.c.bf16 %v1006_v62, %v1005_v61  ;;  %v1498_v61 = vld [vmem:[#allocation7 + $0x78] sm:$0xff] }
  0xb4   : > { %2248 = vmatpush1.bf16.msra.mxu0 %v2247_v41  ;;  %v2286_v41 = vpack.c.bf16 %v760_v39, %v759_v38 }
  0xb5   : > { %2250 = vmatprep.subr.bf16.mxu0 %v2249_v42  ;;  %2272 = vmatpush3.bf16.msra.mxu1 %v2271_v56  ;;  %v762_v42 = vld [vmem:[#allocation7 + $0x18] sm:$0xff] }
  0xb6   : > { %2273 = vmatprep.subr.bf16.mxu1 %v2726_v1  ;;  %v2289_v43 = vpack.c.bf16 %v762_v42, %v761_v40 }
  0xb8   : > { %2252 = vmatpush1.bf16.msra.mxu0 %v2251_v50 }
  0xb9   : > { %2254 = vmatprep.subr.bf16.mxu0 %v2253_v51  ;;  %2275 = vmatpush3.bf16.msra.mxu1 %v2274_v63  ;;  %v1007_v63 = vld [vmem:[#allocation7 + $0x30] sm:$0xff] }
  0xba   : > { %2276 = vmatprep.subr.bf16.mxu1 %v2726_v1 }
  0xbc   : > { %2256 = vmatpush1.bf16.msra.mxu0 %v2255_v59 }
  0xbd   : > { %2258 = vmatprep.subr.bf16.mxu0 %v2257_v60  ;;  %2278 = vmatpush3.bf16.msra.mxu1 %v2277_v5 }
  0xbe   : > { %2279 = vmatprep.subr.bf16.mxu1 %v2726_v1 }
  0xc0   : > { %2260 = vmatpush1.bf16.msra.mxu0 %v2259_v4  ;;  %v2295_v4 = vpack.c.bf16 %v1008_v3, %v1007_v63 }
  0xc1   : > { %2285 = vmatprep.subr.bf16.mxu0 %v2726_v1  ;;  %2281 = vmatpush3.bf16.msra.mxu1 %v2280_v9 }
  0xc2   : > { %2282 = vmatprep.subr.bf16.mxu1 %v2726_v1 }
  0xc3   : > { %516 = vmatmul.mubr.f32.vlgmr.msra.gmra.mrb[0].mxu0 %v3017_v8 }
  0xc4   : > { %2163 = vmatprep.mubr.msk.f32.mxu0 %vm2727_vm0, %v2725_v0  ;;  %2287 = vmatpush3.bf16.msra.mxu0 %v2286_v41 }
  0xc5   : > { %2284 = vmatpush3.bf16.msra.mxu1 %v2283_v12  ;;  %2288 = vmatprep.subr.bf16.mxu0 %v2726_v1 }
  0xc6   : > { %2145 = vmatprep.subr.mxu1 %v2725_v0 }
  0xc8   : > { %2143 = vmatmul.mubr.f32.vlgmr.msra.gmra.mrb[0].mxu1 %v3017_v8  ;;  %2290 = vmatpush3.bf16.msra.mxu0 %v2289_v43 }
  0xc9   : > { %2147 = vmatprep.mubr.msk.f32.mxu1 %vm2727_vm0, %v2725_v0  ;;  %2291 = vmatprep.subr.bf16.mxu0 %v2726_v1 }
 0x196   : > { %v517_v19 = vpop.f32.mrb[0].mxu0 }
 0x197   : > { %v519_v21 = vpop.f32.mrb[1].mxu0  ;;  %v3048_v23 = vadd.f32 %v517_v19, %v439_v20 }
 0x198   : > { %v3042_v22 = vadd.f32 %v519_v21, %v443_v18 }
 0x19a   : > { %839 = vrot.lane.b32.xlu1 %v3042_v22, %s2728_s13  ;;  %2146 = vmatpush3.xpose.msk.msra.mxu1 %vm596_vm1, %v3042_v22 }
 0x19b   : > { %2150 = vmatprep.subr.mxu1 %v2725_v0  ;;  %v588_v26 = vpop.f32.mrb[0].mxu1 }
 0x19c   : > { %v3058_v27 = vadd.f32 %v588_v26, %v447_v25  ;;  %v2144_v28 = vpop.f32.mrb[1].mxu1 }
 0x19d   : > { %2148 = vmatmul.mubr.msk.f32.vlgmr.msra.gmra.mrb[2].mxu1 %vm596_vm1, %v3048_v23 }
 0x19e   : > { %837 = vrot.lane.b32.xlu1 %v3048_v23, %s2728_s13  ;;  %2152 = vmatprep.mubr.msk.f32.mxu1 %vm2727_vm0, %v2725_v0 }
 0x19f   : > { %2151 = vmatpush3.msra.mxu1 %v3058_v27 }
 0x1a0   : > { %2166 = vmatprep.subr.mxu1 %v2725_v0 }
 0x20c   : > { %v840_v46 = vpop.permute.xlu1 %839 }
 0x210   : > { %v838_v48 = vpop.permute.xlu1 %837 }
 0x270   : > { %v669_v29 = vpop.f32.mrb[2].mxu1 }
 0x271   : > { %v673_v30 = vmul.f32 0.17677669, %v669_v29  ;;  %v2149_v31 = vpop.f32.mrb[3].mxu1 }
 0x272   : > { %v1251_v31 = vld [vmem:[#allocation7 + $0x48] sm:$0xff] }
 0x273   : > { %v675_v32 = vsel %vm674_vm2, %v673_v30, -inf }
 0x274   : > { %676 = vmax.xlane.f32.xlu0 %v675_v32  ;;  %v1252_v32 = vld [vmem:[#allocation7 + $0x50] sm:$0xff] }
 0x301   : > { %v677_v33 = vpop.xlane.xlu0 %676 }
 0x302   : > { %v678_v34 = vsub.f32 %v673_v30, %v677_v33  ;;  %v1250_v30 = vld [vmem:[#allocation7 + $0x40] sm:$0xff] }
 0x303   : > { %v2298_v33 = vpack.c.bf16 %v1251_v31, %v1250_v30  ;;  %v1606_v31 = vld [vmem:[#allocation8 + $0x50] sm:$0xff] }
 0x304   : > { %v679_v35 = vmul.f32 1.442695, %v678_v34  ;;  %v1253_v34 = vld [vmem:[#allocation7 + $0x58] sm:$0xff] }
 0x306   : > { %2472 = vpow2.f32 %v679_v35  ;;  %v2301_v35 = vpack.c.bf16 %v1253_v34, %v1252_v32 }
 0x310   : > { %v2473_v36 = vpop.eup %2472 }
 0x311   : > { %v681_v37 = vsel %vm674_vm2, %v2473_v36, 0.0 }
 0x312   : > { %682 = vadd.xlane.f32.xlu0 %v681_v37 }
 0x39f   : > { %v683_v44 = vpop.xlane.xlu0 %682 }
 0x3a0   : > { %2474 = vrcp.f32 %v683_v44 }
 0x3aa   : > { %v2475_v45 = vpop.eup %2474 }
 0x3ab   : > { %v685_v47 = vmul.f32 %v2475_v45, %v2473_v36  ;;  %v1996_v36 = vld [vmem:[%s3213_s7] ss:$0 sm:$0xff] }
 0x3ad   : > { %2153 = vmatmul.mubr.msk.f32.vlgmr.msra.gmra.mrb[4].mxu1 %vm674_vm2, %v685_v47 }
 0x3ae   : > { %2167 = vmatpush3.xpose.msk.msra.mxu1 %vm596_vm1, %v840_v46  ;;  %2168 = vmatprep.mubr.msk.f32.mxu1 %vm2727_vm0, %v2725_v0 }
 0x3af   : > { %2171 = vmatprep.subr.mxu1 %v2725_v0 }
 0x3b1   : > { %2169 = vmatmul.mubr.msk.f32.vlgmr.msra.gmra.mrb[6].mxu1 %vm596_vm1, %v838_v48 }
 0x3b2   : > { %2173 = vmatprep.mubr.msk.f32.mxu1 %vm2727_vm0, %v2725_v0 }
 0x480   : > { %v755_v49 = vpop.f32.mrb[4].mxu1 }
 0x481   : > { %v2154_v50 = vpop.f32.mrb[5].mxu1  ;;  %2164 = vmatmul.mubr.msk.f32.vlgmr.msra.gmra.mrb[2].mxu0 %vm596_vm1, %v755_v49 }
 0x482   : > { %2184 = vmatprep.mubr.msk.f32.mxu0 %vm2727_vm0, %v2725_v0  ;;  %2293 = vmatpush3.bf16.msra.mxu0 %v2292_v2 }
 0x483   : > { %2294 = vmatprep.subr.bf16.mxu0 %v2726_v1 }
 0x484   : > { %v911_v51 = vpop.f32.mrb[6].mxu1 }
 0x485   : > { %v915_v52 = vmul.f32 0.17677669, %v911_v51  ;;  %v2170_v53 = vpop.f32.mrb[7].mxu1 }
 0x486   : > { %2296 = vmatpush3.bf16.msra.mxu0 %v2295_v4 }
 0x487   : > { %v916_v54 = vsel %vm674_vm2, %v915_v52, -inf  ;;  %2297 = vmatprep.subr.bf16.mxu0 %v2726_v1 }
 0x488   : > { %917 = vmax.xlane.f32.xlu0 %v916_v54 }
 0x49e   : > { %928 = vrot.lane.b32.xlu0 %v3058_v27, %s2728_s13  ;;  %s2638_s13 = scalar_lea.vmem %s3164_s26, 128 }
 0x49f   : > { %p2639_p6 = scmp.ne.s32.totalorder %s3164_s26, %s2638_s13 }
 0x4a1   : > { %p2640_p2 = pnand %p2639_p6, %p3234_p0 }
 0x4a2   : > { %1085 = vrot.lane.b32.xlu0 %v3042_v22, %s2729_s23 }
 0x4a3   : > { %p2641_p5 = pneg %p2640_p2 }
 0x4a6   : > { %1083 = vrot.lane.b32.xlu0 %v3048_v23, %s2729_s23 }
 0x515   : > { %v918_v55 = vpop.xlane.xlu0 %917 }
 0x516   : > { %v919_v56 = vsub.f32 %v915_v52, %v918_v55 }
 0x518   : > { %v920_v57 = vmul.f32 1.442695, %v919_v56 }
 0x519   : > { %v929_v58 = vpop.permute.xlu0 %928 }
 0x51a   : > { %2476 = vpow2.f32 %v920_v57  ;;  %2172 = vmatpush3.msra.mxu1 %v929_v58  ;;  %v1495_v57 = vld [vmem:[#allocation7 + $0x60] sm:$0xff]  ;;  %v1496_v58 = vld [vmem:[#allocation7 + $0x68] sm:$0xff] }
 0x51b   : > { %2187 = vmatprep.subr.mxu1 %v2725_v0 }
 0x51d   : > { %v1086_v10 = vpop.permute.xlu0 %1085 }
 0x521   : > { %v1084_v12 = vpop.permute.xlu0 %1083 }
 0x524   : > { %v2477_v59 = vpop.eup %2476 }
 0x525   : > { %v922_v60 = vsel %vm674_vm2, %v2477_v59, 0.0 }
 0x526   : > { %923 = vadd.xlane.f32.xlu1 %v922_v60  ;;  %v2304_v60 = vpack.c.bf16 %v1496_v58, %v1495_v57  ;;  %v1620_v57 = vld [vmem:[#allocation8 + $0xc0] sm:$0xff]  ;;  %v1622_v58 = vld [vmem:[#allocation8 + $0xd0] sm:$0xff] }
 0x537   : > { %1173 = vrot.lane.b32.xlu1 %v3058_v27, %s2729_s23  ;;  %s2644_s23 = scalar_lea.vmem %s2643_s10, 256 }
 0x538   : > { %p2646_p1 = scmp.lt.s32.totalorder %s2644_s23, %s2638_s13 }
 0x53a   : > { %p2647_p11 = por %p2646_p1, %p2645_p10 }
 0x53b   : > { %1330 = vrot.lane.b32.xlu1 %v3042_v22, %s2730_s18 }
 0x53c   : > { %p2648_p12 = pnand %p2647_p11, %p2641_p5 }
 0x554   : > { %v832_v5 = vpop.f32.mrb[2].mxu0 }
 0x555   : > { %v2165_v6 = vpop.f32.mrb[3].mxu0  ;;  %v836_v37 = vadd.f32 %v1996_v36, %v832_v5 }
 0x5b3   : > { %v924_v7 = vpop.xlane.xlu1 %923 }
 0x5b4   : > { %2478 = vrcp.f32 %v924_v7 }
 0x5b7   : > { %v1174_v13 = vpop.permute.xlu1 %1173 }
 0x5bb   : > { %v1331_v40 = vpop.permute.xlu1 %1330 }
 0x5be   : > { %v2479_v9 = vpop.eup %2478 }
 0x5bf   : > { %v926_v11 = vmul.f32 %v2479_v9, %v2477_v59  ;;  %v1497_v59 = vld [vmem:[#allocation7 + $0x70] sm:$0xff] }
 0x5c0   : > { %v2307_v62 = vpack.c.bf16 %v1498_v61, %v1497_v59  ;;  %v1625_v59 = vld [vmem:[#allocation8 + $0xe8] sm:$0xff]  ;;  %v2335_v61 = vpack.c.bf16 %v1622_v58, %v1620_v57 }
 0x5c1   : > { %2174 = vmatmul.mubr.msk.f32.vlgmr.msra.gmra.mrb[8].mxu1 %vm674_vm2, %v926_v11 }
 0x5c2   : > { %2188 = vmatpush3.xpose.msk.msra.mxu1 %vm596_vm1, %v1086_v10  ;;  %2189 = vmatprep.mubr.msk.f32.mxu1 %vm2727_vm0, %v2725_v0 }
 0x5c3   : > { %2192 = vmatprep.subr.mxu1 %v2725_v0 }
 0x5c5   : > { %2190 = vmatmul.mubr.msk.f32.vlgmr.msra.gmra.mrb[10].mxu1 %vm596_vm1, %v1084_v12  ;;  %v1597_v12 = vld [vmem:[#allocation8 + $0x8] sm:$0xff] }
 0x5c6   : > { %2193 = vmatpush3.msra.mxu1 %v1174_v13  ;;  %2194 = vmatprep.mubr.msk.f32.mxu1 %vm2727_vm0, %v2725_v0  ;;  %v1599_v13 = vld [vmem:[#allocation8 + $0x18] sm:$0xff] }
 0x5c7   : > { %2208 = vmatprep.subr.mxu1 %v2725_v0 }
 0x694   : > { %v1000_v16 = vpop.f32.mrb[8].mxu1 }
 0x695   : > { %v2175_v18 = vpop.f32.mrb[9].mxu1  ;;  %2185 = vmatmul.mubr.msk.f32.vlgmr.msra.gmra.mrb[4].mxu0 %vm596_vm1, %v1000_v16  ;;  %v1596_v16 = vld [vmem:[#allocation8] sm:$0xff] }
 0x696   : > { %2205 = vmatprep.mubr.msk.f32.mxu0 %vm2727_vm0, %v2725_v0  ;;  %2299 = vmatpush3.bf16.msra.mxu0 %v2298_v33  ;;  %v2309_v18 = vpack.c.bf16 %v1599_v13, %v1597_v12  ;;  %v2013_v13 = vld [vmem:[%s3213_s7 + $0x1] ss:$0 sm:$0xff] }
 0x697   : > { %2300 = vmatprep.subr.bf16.mxu0 %v2726_v1 }
 0x698   : > { %v1157_v19 = vpop.f32.mrb[10].mxu1 }
 0x699   : > { %v1161_v20 = vmul.f32 0.17677669, %v1157_v19  ;;  %v2191_v21 = vpop.f32.mrb[11].mxu1  ;;  %v1598_v19 = vld [vmem:[#allocation8 + $0x10] sm:$0xff] }
 0x69a   : > { %2302 = vmatpush3.bf16.msra.mxu0 %v2301_v35  ;;  %v1603_v21 = vld [vmem:[#allocation8 + $0x38] sm:$0xff] }
 0x69b   : > { %v1162_v22 = vsel %vm674_vm2, %v1161_v20, -inf  ;;  %2303 = vmatprep.subr.bf16.mxu0 %v2726_v1 }
 0x69c   : > { %1163 = vmax.xlane.f32.xlu0 %v1162_v22  ;;  %v2311_v22 = vpack.c.bf16 %v1598_v19, %v1596_v16 }
 0x729   : > { %v1164_v24 = vpop.xlane.xlu0 %1163 }
 0x72a   : > { %v1165_v25 = vsub.f32 %v1161_v20, %v1164_v24  ;;  %v1601_v20 = vld [vmem:[#allocation8 + $0x28] sm:$0xff] }
 0x72b   : > { %v2313_v24 = vpack.c.bf16 %v1603_v21, %v1601_v20  ;;  %v1747_v21 = vld [vmem:[#allocation10 + $0x90] sm:$0xff] }
 0x72c   : > { %v1166_v26 = vmul.f32 1.442695, %v1165_v25  ;;  %v1602_v25 = vld [vmem:[#allocation8 + $0x30] sm:$0xff] }
 0x72e   : > { %2480 = vpow2.f32 %v1166_v26  ;;  %v1605_v26 = vld [vmem:[#allocation8 + $0x48] sm:$0xff] }
 0x738   : > { %v2481_v28 = vpop.eup %2480 }
 0x739   : > { %v1168_v29 = vsel %vm674_vm2, %v2481_v28, 0.0 }
 0x73a   : > { %1169 = vadd.xlane.f32.xlu1 %v1168_v29 }
 0x74b   : > { %1328 = vrot.lane.b32.xlu1 %v3048_v23, %s2730_s18 }
 0x768   : > { %v1078_v38 = vpop.f32.mrb[4].mxu0 }
 0x769   : > { %v1082_v39 = vadd.f32 %v1078_v38, %v836_v37  ;;  %v2186_v23 = vpop.f32.mrb[5].mxu0  ;;  %v1609_v37 = vld [vmem:[#allocation8 + $0x68] sm:$0xff]  ;;  %v1611_v38 = vld [vmem:[#allocation8 + $0x78] sm:$0xff] }
 0x76a   : > { %v1608_v23 = vld [vmem:[#allocation8 + $0x60] sm:$0xff] }
 0x7c7   : > { %v1170_v41 = vpop.xlane.xlu1 %1169 }
 0x7c8   : > { %2482 = vrcp.f32 %v1170_v41 }
 0x7cb   : > { %v1329_v44 = vpop.permute.xlu1 %1328 }
 0x7d2   : > { %v2483_v42 = vpop.eup %2482 }
 0x7d3   : > { %v1172_v43 = vmul.f32 %v2483_v42, %v2481_v28  ;;  %v1607_v28 = vld [vmem:[#allocation8 + $0x58] sm:$0xff]  ;;  %v1613_v42 = vld [vmem:[#allocation8 + $0x88] sm:$0xff] }
 0x7d4   : > { %v2317_v30 = vpack.c.bf16 %v1607_v28, %v1605_v26  ;;  %v1749_v28 = vld [vmem:[#allocation10 + $0xa0] sm:$0xff] }
 0x7d5   : > { %2195 = vmatmul.mubr.msk.f32.vlgmr.msra.gmra.mrb[12].mxu1 %vm674_vm2, %v1172_v43  ;;  %v1615_v43 = vld [vmem:[#allocation8 + $0x98] sm:$0xff] }
 0x7d6   : > { %2209 = vmatpush3.xpose.msk.msra.mxu1 %vm596_vm1, %v1331_v40  ;;  %2210 = vmatprep.mubr.msk.f32.mxu1 %vm2727_vm0, %v2725_v0  ;;  %v1610_v40 = vld [vmem:[#allocation8 + $0x70] sm:$0xff] }
 0x7d7   : > { %2213 = vmatprep.subr.mxu1 %v2725_v0  ;;  %v2323_v41 = vpack.c.bf16 %v1610_v40, %v1608_v23  ;;  %v1754_v23 = vld [vmem:[#allocation10 + $0xc8] sm:$0xff]  ;;  %v1737_v40 = vld [vmem:[#allocation10 + $0x40] sm:$0xff] }
 0x7d9   : > { %2211 = vmatmul.mubr.msk.f32.vlgmr.msra.gmra.mrb[14].mxu1 %vm596_vm1, %v1329_v44  ;;  %v2325_v44 = vpack.c.bf16 %v1615_v43, %v1613_v42  ;;  %v1755_v43 = vld [vmem:[#allocation10 + $0xd0] sm:$0xff] }
 0x7da   : > { %2215 = vmatprep.mubr.msk.f32.mxu1 %vm2727_vm0, %v2725_v0 }
 0x8a8   : > { %v1245_v45 = vpop.f32.mrb[12].mxu1 }
 0x8a9   : > { %v2196_v46 = vpop.f32.mrb[13].mxu1  ;;  %2206 = vmatmul.mubr.msk.f32.vlgmr.msra.gmra.mrb[6].mxu0 %vm596_vm1, %v1245_v45  ;;  %v1612_v45 = vld [vmem:[#allocation8 + $0x80] sm:$0xff] }
 0x8aa   : > { %2226 = vmatprep.mubr.msk.f32.mxu0 %vm2727_vm0, %v2725_v0  ;;  %2305 = vmatpush3.bf16.msra.mxu0 %v2304_v60  ;;  %v1614_v46 = vld [vmem:[#allocation8 + $0x90] sm:$0xff]  ;;  %v1627_v60 = vld [vmem:[#allocation8 + $0xf8] sm:$0xff] }
 0x8ab   : > { %2306 = vmatprep.subr.bf16.mxu0 %v2726_v1 }
 0x8ac   : > { %v1402_v47 = vpop.f32.mrb[14].mxu1 }
 0x8ad   : > { %v1406_v48 = vmul.f32 0.17677669, %v1402_v47  ;;  %v2212_v49 = vpop.f32.mrb[15].mxu1  ;;  %v1617_v47 = vld [vmem:[#allocation8 + $0xa8] sm:$0xff] }
 0x8ae   : > { %2308 = vmatpush3.bf16.msra.mxu0 %v2307_v62  ;;  %v1619_v49 = vld [vmem:[#allocation8 + $0xb8] sm:$0xff]  ;;  %v2337_v62 = vpack.c.bf16 %v1627_v60, %v1625_v59  ;;  %v1743_v59 = vld [vmem:[#allocation10 + $0x70] sm:$0xff] }
 0x8af   : > { %v1407_v50 = vsel %vm674_vm2, %v1406_v48, -inf  ;;  %v1744_v60 = vld [vmem:[#allocation10 + $0x78] sm:$0xff] }
 0x8b0   : > { %1408 = vmax.xlane.f32.xlu0 %v1407_v50  ;;  %v1616_v50 = vld [vmem:[#allocation8 + $0xa0] sm:$0xff] }
 0x8c6   : > { %1418 = vrot.lane.b32.xlu0 %v3058_v27, %s2730_s18 }
 0x93d   : > { %v1409_v51 = vpop.xlane.xlu0 %1408 }
 0x93e   : > { %v1410_v52 = vsub.f32 %v1406_v48, %v1409_v51  ;;  %v2327_v48 = vpack.c.bf16 %v1614_v46, %v1612_v45  ;;  %v1618_v51 = vld [vmem:[#allocation8 + $0xb0] sm:$0xff] }
 0x940   : > { %v1411_v53 = vmul.f32 1.442695, %v1410_v52  ;;  %v2329_v52 = vpack.c.bf16 %v1619_v49, %v1617_v47  ;;  %v1739_v47 = vld [vmem:[#allocation10 + $0x50] sm:$0xff]  ;;  %v1757_v49 = vld [vmem:[#allocation10 + $0xe0] sm:$0xff] }
 0x941   : > { %v1419_v54 = vpop.permute.xlu0 %1418 }
 0x942   : > { %2484 = vpow2.f32 %v1411_v53  ;;  %2214 = vmatpush3.msra.mxu1 %v1419_v54  ;;  %v1621_v53 = vld [vmem:[#allocation8 + $0xc8] sm:$0xff]  ;;  %v1623_v54 = vld [vmem:[#allocation8 + $0xd8] sm:$0xff] }
 0x943   : > { %2310 = vmatprep.subr.bf16.mxu1 %v2309_v18  ;;  %v2014_v18 = vld [vmem:[%s3213_s7 + $0x2] ss:$0 sm:$0xff] }
 0x94c   : > { %v2485_v55 = vpop.eup %2484 }
 0x94d   : > { %v1413_v56 = vsel %vm674_vm2, %v2485_v55, 0.0 }
 0x94e   : > { %1414 = vadd.xlane.f32.xlu1 %v1413_v56  ;;  %v2333_v56 = vpack.c.bf16 %v1623_v54, %v1621_v53  ;;  %v1741_v53 = vld [vmem:[#allocation10 + $0x60] sm:$0xff]  ;;  %v1742_v54 = vld [vmem:[#allocation10 + $0x68] sm:$0xff] }
 0x94f   : > { %v2367_v57 = vpack.c.bf16 %v1742_v54, %v1741_v53 }
 0x97c   : > { %v1323_v27 = vpop.f32.mrb[6].mxu0 }
 0x97d   : > { %v1327_v63 = vadd.f32 %v1323_v27, %v1082_v39  ;;  %v2207_v2 = vpop.f32.mrb[7].mxu0  ;;  %v2321_v39 = vpack.c.bf16 %v1611_v38, %v1609_v37  ;;  %v1624_v27 = vld [vmem:[#allocation8 + $0xe0] sm:$0xff]  ;;  %v1736_v37 = vld [vmem:[#allocation10 + $0x38] sm:$0xff] }
 0x97e   : > { %v1753_v38 = vld [vmem:[#allocation10 + $0xc0] sm:$0xff] }
 0x97f   : > { %v2357_v42 = vpack.c.bf16 %v1754_v23, %v1753_v38 }
 0x9db   : > { %v1415_v3 = vpop.xlane.xlu1 %1414 }
 0x9dc   : > { %2486 = vrcp.f32 %v1415_v3  ;;  %v1745_v3 = vld [vmem:[#allocation10 + $0x80] sm:$0xff] }
 0x9e6   : > { %v2487_v4 = vpop.eup %2486 }
 0x9e7   : > { %v1417_v5 = vmul.f32 %v2487_v4, %v2485_v55  ;;  %v2331_v55 = vpack.c.bf16 %v1618_v51, %v1616_v50  ;;  %v1746_v4 = vld [vmem:[#allocation10 + $0x88] sm:$0xff] }
 0x9e8   : > { %v1758_v50 = vld [vmem:[#allocation10 + $0xe8] sm:$0xff] }
 0x9e9   : > { %2216 = vmatmul.mubr.msk.f32.vlgmr.msra.gmra.mrb[16].mxu1 %vm674_vm2, %v1417_v5  ;;  %v1729_v5 = vld [vmem:[#allocation10] sm:$0xff] }
 0x9ea   : > { %1704 = vmatprep.mubr.f32.mxu1 %v2725_v0  ;;  %v1600_v0 = vld [vmem:[#allocation8 + $0x20] sm:$0xff]  ;;  %2312 = vmatpush1.bf16.msra.mxu1 %v2311_v22  ;;  %v1748_v22 = vld [vmem:[#allocation10 + $0x98] sm:$0xff] }
 0x9eb   : > { %v2315_v29 = vpack.c.bf16 %v1602_v25, %v1600_v0  ;;  %2314 = vmatprep.subr.bf16.mxu1 %v2313_v24  ;;  %v2345_v24 = vpack.c.bf16 %v1748_v22, %v1747_v21  ;;  %v1731_v0 = vld [vmem:[#allocation10 + $0x10] sm:$0xff]  ;;  %v1732_v25 = vld [vmem:[#allocation10 + $0x18] sm:$0xff] }
 0x9ec   : > { %v2347_v26 = vpack.c.bf16 %v1732_v25, %v1731_v0 }
 0x9ee   : > { %2316 = vmatpush1.bf16.msra.mxu1 %v2315_v29  ;;  %v1750_v29 = vld [vmem:[#allocation10 + $0xa8] sm:$0xff] }
 0x9ef   : > { %2318 = vmatprep.subr.bf16.mxu1 %v2317_v30  ;;  %v2349_v30 = vpack.c.bf16 %v1750_v29, %v1749_v28 }
 0xabc   : > { %v1490_v6 = vpop.f32.mrb[16].mxu1 }
 0xabd   : > { %v2217_v7 = vpop.f32.mrb[17].mxu1  ;;  %2227 = vmatmul.mubr.msk.f32.vlgmr.msra.gmra.mrb[8].mxu0 %vm596_vm1, %v1490_v6  ;;  %v2341_v6 = vpack.c.bf16 %v1746_v4, %v1745_v3 }
 0xabe   : > { %v1730_v7 = vld [vmem:[#allocation10 + $0x8] sm:$0xff] }
 0xabf   : > { %2342 = vmatprep.subr.bf16.mxu0 %v2341_v6 }
 0xb90   : > { %v1568_v9 = vpop.f32.mrb[8].mxu0 }
 0xb91   : > { %v1572_v10 = vadd.f32 %v1568_v9, %v1327_v63  ;;  %v2228_v11 = vpop.f32.mrb[9].mxu0  ;;  %v1626_v63 = vld [vmem:[#allocation8 + $0xf0] sm:$0xff]  ;;  %v2343_v9 = vpack.c.bf16 %v1730_v7, %v1729_v5 }
 0xb92   : > { %v2339_v2 = vpack.c.bf16 %v1626_v63, %v1624_v27 }
 0xb93   : > { %v1573_v1 = vadd.f32 %v1572_v10, %v3017_v8  ;;  %v1604_v8 = vld [vmem:[#allocation8 + $0x40] sm:$0xff]  ;;  %2344 = vmatpush3.bf16.msra.mxu0 %v2343_v9 }
 0xb94   : > { %v2319_v32 = vpack.c.bf16 %v1606_v31, %v1604_v8  ;;  %2346 = vmatprep.subr.bf16.mxu0 %v2345_v24  ;;  %v1733_v8 = vld [vmem:[#allocation10 + $0x20] sm:$0xff]  ;;  %v1734_v31 = vld [vmem:[#allocation10 + $0x28] sm:$0xff] }
 0xb95   : > { %1574 = vadd.xlane.f32.xlu0 %v1573_v1 }
 0xb96   : > { %2320 = vmatpush1.bf16.msra.mxu1 %v2319_v32  ;;  %v2351_v32 = vpack.c.bf16 %v1734_v31, %v1733_v8 }
 0xb97   : > { %2322 = vmatprep.subr.bf16.mxu1 %v2321_v39  ;;  %2348 = vmatpush3.bf16.msra.mxu0 %v2347_v26  ;;  %v2015_v26 = vld [vmem:[%s3213_s7 + $0x3] ss:$0 sm:$0xff] }
 0xb98   : > { %2350 = vmatprep.subr.bf16.mxu0 %v2349_v30 }
 0xb9a   : > { %2324 = vmatpush1.bf16.msra.mxu1 %v2323_v41  ;;  %v1738_v41 = vld [vmem:[#allocation10 + $0x48] sm:$0xff] }
 0xb9b   : > { %2326 = vmatprep.subr.bf16.mxu1 %v2325_v44  ;;  %2352 = vmatpush3.bf16.msra.mxu0 %v2351_v32  ;;  %v1756_v44 = vld [vmem:[#allocation10 + $0xd8] sm:$0xff]  ;;  %v2359_v45 = vpack.c.bf16 %v1738_v41, %v1737_v40 }
 0xb9c   : > { %v2361_v46 = vpack.c.bf16 %v1756_v44, %v1755_v43 }
 0xb9e   : > { %2328 = vmatpush1.bf16.msra.mxu1 %v2327_v48  ;;  %v1740_v48 = vld [vmem:[#allocation10 + $0x58] sm:$0xff] }
 0xb9f   : > { %2330 = vmatprep.subr.bf16.mxu1 %v2329_v52  ;;  %v2363_v51 = vpack.c.bf16 %v1740_v48, %v1739_v47  ;;  %v2365_v52 = vpack.c.bf16 %v1758_v50, %v1757_v49 }
 0xba2   : > { %2332 = vmatpush1.bf16.msra.mxu1 %v2331_v55  ;;  %v1759_v55 = vld [vmem:[#allocation10 + $0xf0] sm:$0xff] }
 0xba3   : > { %2334 = vmatprep.subr.bf16.mxu1 %v2333_v56  ;;  %v1760_v56 = vld [vmem:[#allocation10 + $0xf8] sm:$0xff] }
 0xba4   : > { %v2369_v58 = vpack.c.bf16 %v1760_v56, %v1759_v55 }
 0xba6   : > { %2336 = vmatpush1.bf16.msra.mxu1 %v2335_v61  ;;  %v2371_v61 = vpack.c.bf16 %v1744_v60, %v1743_v59 }
 0xba7   : > { %2338 = vmatprep.subr.bf16.mxu1 %v2337_v62  ;;  %v1628_v62 = vld [vmem:[%s3211_s5] sm:$0x3] }
 0xba8   : > { %v1633_v27 = vrot.slane %v1628_v62, %v438_v17  ;;  %v1637_v63 = vrot.slane %v1628_v62, %v442_v15 }
 0xbaa   : > { %2340 = vmatpush1.bf16.msra.mxu1 %v2339_v2 }
 0xc22   : > { %v1575_v33 = vpop.xlane.xlu0 %1574 }
 0xc23   : > { %v1577_v34 = vmul.f32 0.0078125, %v1575_v33  ;;  %v1751_v33 = vld [vmem:[#allocation10 + $0xb0] sm:$0xff] }
 0xc25   : > { %v1578_v35 = vsub.f32 %v1573_v1, %v1577_v34  ;;  %v1752_v34 = vld [vmem:[#allocation10 + $0xb8] sm:$0xff] }
 0xc27   : > { %v1579_v36 = vmul.f32 %v1578_v35, %v1578_v35 }
 0xc29   : > { %1580 = vadd.xlane.f32.xlu1 %v1579_v36  ;;  %v1735_v36 = vld [vmem:[#allocation10 + $0x30] sm:$0xff] }
 0xc2a   : > { %v2355_v39 = vpack.c.bf16 %v1736_v37, %v1735_v36 }
 0xcb6   : > { %v1581_v10 = vpop.xlane.xlu1 %1580 }
 0xcb7   : > { %v1582_v11 = vmul.f32 0.0078125, %v1581_v10 }
 0xcb9   : > { %v1583_v1 = vadd.f32 1e-12, %v1582_v11 }
 0xcbb   : > { %2488 = vrsqrt.f32 %v1583_v1 }
 0xcc5   : > { %v2489_v12 = vpop.eup %2488 }
 0xcc6   : > { %v1585_v16 = vmul.f32 %v2489_v12, %v1578_v35  ;;  %v2353_v35 = vpack.c.bf16 %v1752_v34, %v1751_v33 }
 0xcc8   : > { %v1590_v19 = vmul.f32 %v2013_v13, %v1585_v16  ;;  %2354 = vmatprep.subr.bf16.mxu0 %v2353_v35 }
 0xcc9   : > { %2356 = vmatpush3.bf16.msra.mxu0 %v2355_v39  ;;  %v2016_v39 = vld [vmem:[%s3213_s7 + $0x4] ss:$0 sm:$0xff] }
 0xcca   : > { %v3136_v20 = vadd.f32 %v2014_v18, %v1590_v19  ;;  %2358 = vmatprep.subr.bf16.mxu0 %v2357_v42 }
 0xccc   : > { %1705 = vmatmul.mubr.f32.vlgmr.msra.gmra.mrb[18].mxu1 %v3136_v20 }
 0xccd   : > { %2360 = vmatpush3.bf16.msra.mxu0 %v2359_v45 }
 0xcce   : > { %2362 = vmatprep.subr.bf16.mxu0 %v2361_v46 }
 0xcd1   : > { %2364 = vmatpush3.bf16.msra.mxu0 %v2363_v51 }
 0xcd2   : > { %2366 = vmatprep.subr.bf16.mxu0 %v2365_v52 }
 0xcd5   : > { %2368 = vmatpush3.bf16.msra.mxu0 %v2367_v57 }
 0xcd6   : > { %2370 = vmatprep.subr.bf16.mxu0 %v2369_v58 }
 0xcd9   : > { %2372 = vmatpush3.bf16.msra.mxu0 %v2371_v61 }
 0xd9f   : > { %v1706_v2 = vpop.f32.mrb[18].mxu1 }
 0xda0   : > { %v1707_v3 = vadd.f32 %v1706_v2, %v1633_v27  ;;  %v1708_v4 = vpop.f32.mrb[19].mxu1 }
 0xda1   : > { %v1709_v5 = vadd.f32 %v1708_v4, %v1637_v63 }
 0xda2   : > { %v1713_v6 = vmul.f32 0.044715, %v1707_v3  ;;  %v1711_v22 = vmul.f32 0.5, %v1707_v3 }
 0xda3   : > { %v1714_v7 = vmul.f32 0.044715, %v1709_v5  ;;  %v1712_v15 = vmul.f32 0.5, %v1709_v5 }
 0xda4   : > { %v1715_v9 = vmul.f32 %v1713_v6, %v1707_v3 }
 0xda5   : > { %v1716_v10 = vmul.f32 %v1714_v7, %v1709_v5 }
 0xda6   : > { %v1717_v11 = vmul.f32 %v1715_v9, %v1707_v3 }
 0xda7   : > { %v1718_v1 = vmul.f32 %v1716_v10, %v1709_v5 }
 0xda8   : > { %v1719_v12 = vadd.f32 %v1717_v11, %v1707_v3 }
 0xda9   : > { %v1720_v13 = vadd.f32 %v1718_v1, %v1709_v5 }
 0xdaa   : > { %v1721_v16 = vmul.f32 0.7978846, %v1719_v12 }
 0xdab   : > { %v1722_v18 = vmul.f32 0.7978846, %v1720_v13 }
 0xdac   : > { %2490 = vtanh.f32 %v1721_v16 }
 0xdad   : > { %2492 = vtanh.f32 %v1722_v18 }
 0xdb6   : > { %v2491_v17 = vpop.eup %2490 }
 0xdb7   : > { %v2493_v19 = vpop.eup %2492  ;;  %v1725_v14 = vadd.f32 1.0, %v2491_v17 }
 0xdb8   : > { %v1726_v21 = vadd.f32 1.0, %v2493_v19 }
 0xdb9   : > { %v1727_v0 = vmul.f32 %v1725_v14, %v1711_v22 }
 0xdba   : > { %v1728_v24 = vmul.f32 %v1726_v21, %v1712_v15 }
 0xdbc   : > { %1829 = vmatprep.mubr.f32.mxu0 %v1728_v24 }
 0xdbd   : > { %1830 = vmatmul.mubr.f32.vlgmr.msra.gmra.mrb[10].mxu0 %v1727_v0 }
 0xe90   : > { %v2107_v25 = vpop.f32.mrb[10].mxu0 }
 0xe91   : > { %v2108_v28 = vpop.f32.mrb[11].mxu0 }
 0xe92   : > { %v2109_v29 = vadd.f32 %v2108_v28, %v2107_v25 }
 0xe94   : > { %v1832_v30 = vadd.f32 %v2109_v29, %v2015_v26 }
 0xe96   : > { %v1835_v8 = vadd.f32 %v1832_v30, %v3136_v20  ;;  %v2017_v20 = vld [vmem:[%s3213_s7 + $0x5] ss:$0 sm:$0xff] }
 0xe98   : > { %1836 = vadd.xlane.f32.xlu1 %v1835_v8 }
 0xf25   : > { %v1837_v31 = vpop.xlane.xlu1 %1836 }
 0xf26   : > { %v1838_v32 = vmul.f32 0.0078125, %v1837_v31 }
 0xf28   : > { %v1839_v33 = vsub.f32 %v1835_v8, %v1838_v32 }
 0xf2a   : > { %v1840_v34 = vmul.f32 %v1839_v33, %v1839_v33 }
 0xf2c   : > { %1841 = vadd.xlane.f32.xlu1 %v1840_v34 }
 0xfb9   : > { %v1842_v35 = vpop.xlane.xlu1 %1841 }
 0xfba   : > { %v1843_v36 = vmul.f32 0.0078125, %v1842_v35 }
 0xfbc   : > { %v1844_v37 = vadd.f32 1e-12, %v1843_v36 }
 0xfbe   : > { %2494 = vrsqrt.f32 %v1844_v37 }
 0xfc8   : > { %v2495_v38 = vpop.eup %2494 }
 0xfc9   : > { %v1846_v23 = vmul.f32 %v2495_v38, %v1839_v33 }
 0xfcb   : > { %v1851_v40 = vmul.f32 %v2016_v39, %v1846_v23 }
 0xfcd   : > { %v1856_v41 = vadd.f32 %v2017_v20, %v1851_v40 }
 0xfcf   : > { %1857 = vst [vmem:[%s378_s25] sm:$0xff] %v1856_v41 }
 0xfd0   : > { %2651 = shalt.err (!%p2648_p12)
}
 0xfd1   : > { %s2652_s1 = scalar_lea.hbm %s3162_s12, 128  ;;  %s2656_s9 = scalar_lea.hbm %s3214_s8, 256 }
 0xfd2   : > { %p2653_p13 = scmp.ne.s32.totalorder %s3162_s12, %s2652_s1  ;;  %p2657_p9 = scmp.lt.u32.totalorder %s3162_s12, %s3214_s8 }
 0xfd3   : > { %p2658_p4 = scmp.lt.u32.totalorder %s2656_s9, %s2652_s1  ;;  %p2660_p6 = scmp.lt.u32.totalorder %s2652_s1, %s3162_s12 }
 0xfd4   : > { %p2654_p3 = pnand %p2653_p13, %p3234_p0 }
 0xfd5   : > { %p2659_p8 = por %p2658_p4, %p2657_p9 }
 0xfd6   : > { %p2655_p7 = pneg %p2654_p3 }
 0xfd7   : > { %p2661_p2 = por %p2660_p6, %p2659_p8 }
 0xfd9   : > { %p2662_p5 = pnand %p2661_p2, %p2655_p7 }
 0xfdb   : > { %2665 = shalt.err (!%p2662_p5)
}
 0xfdc   : > { %2391 = dma.vmem_to_hbm [thread:$0]  (%p3234_p0), %s3164_s26, 128, %s3162_s12, %s1859_s14  }
 0xfdd PF: > { %s1884_s22 = sand.u32 1, %s2700_s27   ;;  %p3235_p10 = scmp.ne.s32.totalorder %s3227_s24, 0 }
 0xfde   : > { %p3236_p1 = scmp.ge.s32.totalorder %s2712_s30, 2  ;;  %s1885_s17 = scalar_lea.sflag [#allocation4], %s1884_s22 }
 0xfe0   : > { %p2411_p11 = pnand %p3236_p1, %p3235_p10 }
 0xfe2   : > { %2695 = dma.done.wait (!%p2411_p11), %s1885_s17, 128  }
 0xfe3   : > { %2697 = vsyncadd (!%p2411_p11), %s1885_s17, 4294967168  ;;  %p23_p12 = scmp.ge.s32.totalorder %s2913_s15, 4   ;;  %s3237_s27 = smov %s2704_s28 }
 0xfe4   : > { %s3238_s28 = smov %s2708_s29  ;;  %s3239_s29 = smov %s2924_s21 }
 0xfe5   : > { %s3240_s30 = smov %s2913_s15  ;;  %25 = sbr.rel (!%p23_p12) target bundleno = 9 (0x9), region = 116 }
 0xfec   :  { %1890 = vsyncpa [#allocation3], 1 }
 0xfed   :  { %1892 = vsyncpa [#allocation3 + $0x1], 1 }
 0xfee   :  { %1893 = vsyncpa [#allocation6], 1 }
 0xfef   :  { %1894 = vsyncpa [#allocation9], 1 }
 0xff0   :  { %1895 = vsyncpa [#allocation4], 1 }
 0xff1   :  { %1897 = vsyncpa [#allocation4 + $0x1], 1 }

</bundles_post_ra>
